<compile_context>
chip_gen: v5e
topology: v5e:2x2
jax: 0.10.0
libtpu: 0.0.40
codegen_flags: <defaults>
</compile_context>

<pallas_src>
import jax
import jax.numpy as jnp
from jax.experimental import pallas as pl
from jax.experimental.pallas import tpu as pltpu


def _bmm_kernel(a_ref, b_ref, o_ref):
    # a_ref: (HPB, M, K), b_ref: (HPB, K, N), o_ref: (HPB, M, N)
    o_ref[...] = jnp.einsum(
        "gmk,gkn->gmn",
        a_ref[...],
        b_ref[...],
        preferred_element_type=jnp.float32,
    ).astype(o_ref.dtype)


def batched_matmul(a, b):
    """a: [B, H, M, K], b: [B, H, K, N] -> [B, H, M, N] (float32)."""
    B, H, M, K = a.shape
    B2, H2, K2, N = b.shape
    assert (B, H, K) == (B2, H2, K2)

    G = B * H
    a2 = a.reshape(G, M, K)
    b2 = b.reshape(G, K, N)

    # Fuse heads per grid step; keep >=2 grid steps when possible so v7x's two
    # TensorCores both get work ("parallel" axis is sharded across cores).
    if G % 2 == 0 and G >= 2:
        heads_per_block = G // 2
    else:
        heads_per_block = 1
    grid = (G // heads_per_block,)

    itemsize = jnp.dtype(jnp.float32).itemsize
    cost = pl.CostEstimate(
        flops=2 * G * M * K * N,
        transcendentals=0,
        bytes_accessed=(G * M * K + G * K * N + G * M * N) * itemsize,
    )

    out = pl.pallas_call(
        _bmm_kernel,
        out_shape=jax.ShapeDtypeStruct((G, M, N), jnp.float32),
        grid_spec=pl.GridSpec(
            grid=grid,
            in_specs=[
                # Full (M, K) / (K, N) per head, HPB heads per step: every input
                # byte is DMA'd exactly once, in large contiguous transfers.
                pl.BlockSpec((heads_per_block, M, K), lambda g: (g, 0, 0)),
                pl.BlockSpec((heads_per_block, K, N), lambda g: (g, 0, 0)),
            ],
            out_specs=pl.BlockSpec((heads_per_block, M, N), lambda g: (g, 0, 0)),
        ),
        compiler_params=pltpu.CompilerParams(
            dimension_semantics=("parallel",),
        ),
        cost_estimate=cost,
    )(a2, b2)

    return out.reshape(B, H, M, N)


if __name__ == "__main__":
    key = jax.random.PRNGKey(0)
    k1, k2 = jax.random.split(key)

    # Shapes implied by the module's forward: [1, 4, 384, 64] @ [1, 4, 64, 384]
    x131 = jax.random.normal(k1, (1, 4, 384, 64), dtype=jnp.float32)
    x132 = jax.random.normal(k2, (1, 4, 64, 384), dtype=jnp.float32)

    out = batched_matmul(x131, x132)
    out = jax.block_until_ready(out)

    # sanity check against plain JAX reference
    ref = jnp.matmul(x131, x132)
    assert out.shape == (1, 4, 384, 384)
    assert jnp.allclose(out, ref, atol=1e-4, rtol=1e-4)

    print("KERNEL_OK")
</pallas_src>

<mosaic_0001>
module attributes {stable_mosaic.version = 11 : i64} {
  func.func @_bmm_kernel(%arg0: i32, %arg1: memref<2x384x64xf32, #tpu.memory_space<vmem>>, %arg2: memref<2x64x384xf32, #tpu.memory_space<vmem>>, %arg3: memref<2x384x384xf32, #tpu.memory_space<vmem>>) attributes {dimension_semantics = [#tpu.dimension_semantics<parallel>], iteration_bounds = array<i64: 2>, scalar_prefetch = 0 : i64, scratch_operands = 0 : i64, tpu.core_type = #tpu.core_type<tc>, window_params = [{transform_indices = @transform_0, window_bounds = array<i64: 2, 384, 64>}, {transform_indices = @transform_1, window_bounds = array<i64: 2, 64, 384>}, {transform_indices = @transform_2, window_bounds = array<i64: 2, 384, 384>}]} {
    %c0 = arith.constant 0 : index
    %c0_0 = arith.constant 0 : index
    %c0_1 = arith.constant 0 : index
    %0 = vector.load %arg1[%c0, %c0_0, %c0_1] : memref<2x384x64xf32, #tpu.memory_space<vmem>>, vector<2x384x64xf32>
    %c0_2 = arith.constant 0 : index
    %c0_3 = arith.constant 0 : index
    %c0_4 = arith.constant 0 : index
    %1 = vector.load %arg2[%c0_2, %c0_3, %c0_4] : memref<2x64x384xf32, #tpu.memory_space<vmem>>, vector<2x64x384xf32>
    "tpu.trace_start"() <{level = 10 : i32, message = "gmk,gkn->gmn"}> : () -> ()
    %cst = arith.constant dense<0.000000e+00> : vector<2x384x384xf32>
    %2 = tpu.matmul %0, %1, %cst {dimension_numbers = #tpu.dot_dimension_numbers<[2], [1], [1], [2], [0, 0, 0, 1, 1, 2], [0], [0]>} : vector<2x384x64xf32>, vector<2x64x384xf32>, vector<2x384x384xf32> -> vector<2x384x384xf32>
    "tpu.trace_stop"() : () -> ()
    %c0_5 = arith.constant 0 : index
    %c0_6 = arith.constant 0 : index
    %c0_7 = arith.constant 0 : index
    %3 = vector.load %arg3[%c0_5, %c0_6, %c0_7] : memref<2x384x384xf32, #tpu.memory_space<vmem>>, vector<2x384x384xf32>
    tpu.vector_store %arg3[%c0_5, %c0_6, %c0_7], %2 {strides = array<i32>} : memref<2x384x384xf32, #tpu.memory_space<vmem>>, vector<2x384x384xf32>,
    return
  }
  func.func @transform_0(%arg0: i32) -> (i32, i32, i32) {
    %c0_i32 = arith.constant 0 : i32
    %c0_i32_0 = arith.constant 0 : i32
    %c0_i32_1 = arith.constant 0 : i32
    return %arg0, %c0_i32, %c0_i32_0 : i32, i32, i32
  }
  func.func @transform_1(%arg0: i32) -> (i32, i32, i32) {
    %c0_i32 = arith.constant 0 : i32
    %c0_i32_0 = arith.constant 0 : i32
    %c0_i32_1 = arith.constant 0 : i32
    return %arg0, %c0_i32, %c0_i32_0 : i32, i32, i32
  }
  func.func @transform_2(%arg0: i32) -> (i32, i32, i32) {
    %c0_i32 = arith.constant 0 : i32
    %c0_i32_0 = arith.constant 0 : i32
    %c0_i32_1 = arith.constant 0 : i32
    return %arg0, %c0_i32, %c0_i32_0 : i32, i32, i32
  }
}

</mosaic_0001>

<bundles_post_ra>
// kernel: tpu_custom_call.1
= control target key start
LH: loop header
LB: loop body
LE: loop exit
PB: predicated region body
PF: predicated region fallthrough
CT: control target
= control target key end

     0   :  { %7 = vsyncpa [#allocation3], 0  ;;  %s3489_s0 = inlined_call_operand.vmem [shape: f32[4,384,64], index: 0, kind: input, shape index: {}]   ;;  %s3490_s1 = inlined_call_operand.hbm [shape: f32[4,64,384], index: 1, kind: input, shape index: {}]   ;;  %s3491_s2 = inlined_call_operand.hbm [shape: f32[4,384,384], index: 2, kind: output, shape index: {}]  }
   0x1   :  { %9 = vsyncpa [#allocation3 + $0x1], 0 }
   0x2   :  { %10 = vsyncpa [#allocation4], 0 }
   0x3   :  { %12 = vsyncpa [#allocation4 + $0x1], 0  ;;  %s2496_s9 = smov 0   ;;  %s2498_s10 = smov 0  }
   0x4   :  { %s2500_s11 = smov 0   ;;  %s2502_s12 = smov 0  }
   0x5 LB: > { %s2517_s13 = sadd.s32 4294967295, %s2475_s12   ;;  %s1981_s14 = sadd.s32 4294967294, %s2475_s12   ;;  %s2475_s12 = sphi %s2502_s12, %s3499_s12   ;;  %s2471_s11 = sphi %s2500_s11, %s3498_s11   ;;  %s2467_s10 = sphi %s2498_s10, %s3497_s10   ;;  %s2463_s9 = sphi %s2496_s9, %s3496_s9  }
   0x6   : > { %s2521_s15 = sadd.s32 1, %s2475_s12   ;;  %s51_s16 = sadd.s32 1, %s2471_s11 }
   0x7   : > { %s48_s17 = ssub.s32 %s2475_s12, %s2521_s15  ;;  %p58_p0 = scmp.ne.s32.totalorder %s2471_s11, %s2467_s10 }
   0x8   : > { %p49_p1 = scmp.eq.s32.totalorder %s48_s17, 0  ;;  %p59_p2 = scmp.eq.s32.totalorder %s2475_s12, 0 }
   0x9   : > { %p64_p3 = scmp.ne.s32.totalorder %s2467_s10, %s2463_s9  ;;  %p65_p4 = scmp.eq.s32.totalorder %s2517_s13, 0 }
   0xa   : > { %s2533_s18 = scalar_select %p49_p1, %s2471_s11, %s51_s16  }
   0xb   : > { %p60_p5 = por %p59_p2, %p58_p0  ;;  %p2535_p6 = por %p65_p4, %p64_p3 }
   0xc   : > { %p88_p7 = scmp.eq.s32.totalorder %s2517_s13, 1  ;;  %p94_p8 = scmp.eq.s32.totalorder %s1981_s14, 1 }
   0xd   : > { %p1983_p9 = scmp.ge.s32.totalorder %s2475_s12, 2  ;;  %p2317_p10 = scmp.lt.s32.totalorder %s2475_s12, 2 }
   0xe   : > { %p2542_p11 = por %p88_p7, %p58_p0  ;;  %p2546_p12 = por %p94_p8, %p64_p3 }
   0xf   : > { %s124_s22 = sand.u32 1, %s2471_s11   ;;  %s2300_s23 = smul.u32 384, %s2475_s12 }
  0x10   : > { %s2299_s24 = smul.u32 384, %s124_s22  ;;  %p2555_p13 = pnand %p2317_p10, %p60_p5 }
  0x11   : > { %s134_s27 = scalar_lea.hbm %s3490_s1, %s2300_s23  ;;  %s125_s4 = scalar_lea.sflag [#allocation3], %s124_s22 }
  0x12   : > { %s135_s29 = sshll.u32 %s134_s27, 4  ;;  %s128_s30 = scalar_lea.vmem [#allocation2], %s2299_s24  ;;  %s136_s29 = int_to_ptr.hbm [resolvable:$true] %s135_s29 }
  0x13   : > { %s137_s3 = sshll.u32 %s128_s30, 4  ;;  %s2379_s5 = sshra.s32 %s136_s29, 4  ;;  %s138_s3 = int_to_ptr.vmem [resolvable:$true] %s137_s3  ;;  %s2380_s5 = int_to_ptr.hbm [resolvable:$true] %s2379_s5 }
  0x14   : > { %s2381_s6 = scalar_lea.hbm %s2380_s5, 384  ;;  %p2383_p1 = pneg %p2555_p13 }
  0x15   : > { %p2382_p0 = scmp.ne.s32.totalorder %s2380_s5, %s2381_s6  ;;  %s2386_s14 = scalar_lea.hbm %s3490_s1, 768 }
  0x16   : > { %p2387_p4 = scmp.lt.s32.totalorder %s2380_s5, %s3490_s1  ;;  %p2388_p5 = scmp.lt.s32.totalorder %s2386_s14, %s2381_s6 }
  0x17   : > { %p2384_p2 = pnand %p2383_p1, %p2382_p0 }
  0x18   : > { %p2389_p7 = por %p2388_p5, %p2387_p4 }
  0x19   : > { %p2385_p3 = pneg %p2384_p2 }
  0x1b   : > { %p2390_p8 = pnand %p2389_p7, %p2385_p3 }
  0x1d   : > { %2393 = shalt.err (!%p2390_p8)
}
  0x1e   : > { %s2477_s22 = smov 384   ;;  %s2478_s23 = smov 24  }
  0x1f   : > { %2312 = dma.hbm_to_vmem [thread:$0]  (!%p2555_p13), %s136_s29, 6144, %s138_s3, %s125_s4, %s2477_s22, %s2477_s22, %s2478_s23  }
  0x20   : > { %p1987_p10 = scmp.ge.s32.totalorder %s2475_s12, 1  ;;  %p145_p0 = scmp.lt.s32.totalorder %s2475_s12, 3 }
  0x22   : > { %p146_p1 = pnand %p1987_p10, %p145_p0 }
  0x23   : > { %s2572_s24 = sand.u32 (!%p146_p1), 1, %s2467_s10  }
  0x24   : > { %149 = sbr.rel (%p146_p1) target bundleno = 763 (0x2fb), region = 28  ;;  %s152_s26 = scalar_lea.sflag (!%p146_p1), [#allocation3], %s2572_s24 }
  0x25   : > { %s2301_s25 = smul.u32 (!%p146_p1), 384, %s2572_s24 }
  0x27   : > { %s2576_s27 = scalar_lea.vmem (!%p146_p1), [#allocation2], %s2301_s25 }
  0x29   : > { %2454 = dma.done.wait (%p2535_p6), %s152_s26, 6144  }
  0x2a   : > { %2456 = vsyncadd (%p2535_p6), %s152_s26, 4294961152  ;;  %s1988_s28 = sshll.u32 %s2517_s13, 1  ;;  %v309_v0 = vld [vmem:[%s2576_s27 + $0xa8] sm:$0xff]  ;;  %v310_v1 = vld [vmem:[%s2576_s27 + $0xb0] sm:$0xff]  ;;  %vm336_vm0 = vcmask 523264   ;;  %s2302_s4 = smul.u32 2304, %s2572_s24 }
  0x2b   : > { %p184_p13 = scmp.lt.s32.totalorder %s1988_s28, 3  ;;  %v306_v2 = vld [vmem:[%s2576_s27 + $0x90] sm:$0xff]  ;;  %2283 = vmatpush.msra.mxu2 %v309_v0  ;;  %2291 = vmatpush.msra.mxu3 %v310_v1  ;;  %v307_v3 = vld [vmem:[%s2576_s27 + $0x98] sm:$0xff]  ;;  %v304_v5 = vld [vmem:[%s2576_s27 + $0x80] sm:$0xff]  ;;  %s2304_s6 = smul.u32 2304, %s2517_s13 }
  0x2c   : > { %v303_v4 = vld [vmem:[%s2576_s27 + $0x78] sm:$0xff]  ;;  %489 = vmatpush.msra.mxu0 %v309_v0  ;;  %650 = vmatpush.msra.mxu1 %v310_v1  ;;  %v300_v6 = vld [vmem:[%s2576_s27 + $0x60] sm:$0xff]  ;;  %v301_v7 = vld [vmem:[%s2576_s27 + $0x68] sm:$0xff]  ;;  %s2799_s5 = scalar_lea.vmem [#allocation5], %s2302_s4  ;;  %s1880_s13 = scalar_lea.sflag [#allocation4], %s2572_s24 }
  0x2d   : > { %s3501_s28 = smov (!%p184_p13, %s1988_s28), 3  ;;  %2284 = vmatpush.msra.mxu2 %v306_v2  ;;  %2292 = vmatpush.msra.mxu3 %v307_v3  ;;  %v297_v8 = vld [vmem:[%s2576_s27 + $0x48] sm:$0xff]  ;;  %v298_v9 = vld [vmem:[%s2576_s27 + $0x50] sm:$0xff]  ;;  %v295_v11 = vld [vmem:[%s2576_s27 + $0x38] sm:$0xff]  ;;  %s1892_s14 = scalar_lea.hbm %s3491_s2, %s2304_s6 }
  0x2e   : > { %490 = vmatpush.msra.mxu0 %v306_v2  ;;  %651 = vmatpush.msra.mxu1 %v307_v3  ;;  %s2303_s19 = smul.u32 384, %s3501_s28  ;;  %v294_v10 = vld [vmem:[%s2576_s27 + $0x30] sm:$0xff]  ;;  %v291_v12 = vld [vmem:[%s2576_s27 + $0x18] sm:$0xff]  ;;  %v292_v13 = vld [vmem:[%s2576_s27 + $0x20] sm:$0xff]  ;;  %s1893_s16 = sshll.u32 %s2799_s5, 4  ;;  %s1894_s16 = int_to_ptr.vmem [resolvable:$true] %s1893_s16 }
  0x2f   : > { %2285 = vmatpush.msra.mxu2 %v303_v4  ;;  %2293 = vmatpush.msra.mxu3 %v304_v5  ;;  %v288_v14 = vld [vmem:[%s2576_s27] sm:$0xff]  ;;  %v289_v15 = vld [vmem:[%s2576_s27 + $0x8] sm:$0xff]  ;;  %v311_v17 = vld [vmem:[%s2576_s27 + $0xb8] sm:$0xff]  ;;  %s1895_s17 = sshll.u32 %s1892_s14, 4  ;;  %s1896_s17 = int_to_ptr.hbm [resolvable:$true] %s1895_s17 }
  0x30   : > { %491 = vmatpush.msra.mxu0 %v303_v4  ;;  %652 = vmatpush.msra.mxu1 %v304_v5  ;;  %s2600_s3 = scalar_lea.vmem %s3489_s0, %s2303_s19  ;;  %v333_v18 = vld [vmem:[%s2576_s27 + $0x168] sm:$0xff]  ;;  %v334_v20 = vld [vmem:[%s2576_s27 + $0x170] sm:$0xff]  ;;  %v335_v21 = vld [vmem:[%s2576_s27 + $0x178] sm:$0xff]  ;;  %s2423_s22 = sshra.s32 %s1896_s17, 4  ;;  %s2424_s22 = int_to_ptr.hbm [resolvable:$true] %s2423_s22 }
  0x31   : > { %2286 = vmatpush.msra.mxu2 %v300_v6  ;;  %2294 = vmatpush.msra.mxu3 %v301_v7  ;;  %v216_v16 = vld [vmem:[%s2600_s3 + $0xc0] sm:$0xff]  ;;  %v330_v23 = vld [vmem:[%s2576_s27 + $0x150] sm:$0xff]  ;;  %v331_v24 = vld [vmem:[%s2576_s27 + $0x158] sm:$0xff]  ;;  %s2425_s23 = scalar_lea.hbm %s2424_s22, 2304  ;;  %p2430_p4 = scmp.lt.s32.totalorder %s2424_s22, %s3491_s2 }
  0x32   : > { %492 = vmatpush.msra.mxu0 %v300_v6  ;;  %653 = vmatpush.msra.mxu1 %v301_v7  ;;  %v2610_v19 = vld [vmem:[%s2600_s3] sm:$0xff]  ;;  %v217_v26 = vld [vmem:[%s2600_s3 + $0xc8] sm:$0xff]  ;;  %v218_v28 = vld [vmem:[%s2600_s3 + $0xd0] sm:$0xff]  ;;  %p2426_p6 = scmp.ne.s32.totalorder %s2424_s22, %s2425_s23 }
  0x33   : > { %2287 = vmatpush.msra.mxu2 %v297_v8  ;;  %2295 = vmatpush.msra.mxu3 %v298_v9  ;;  %v308_v22 = vld [vmem:[%s2576_s27 + $0xa0] sm:$0xff]  ;;  %v2626_v27 = vld [vmem:[%s2600_s3 + $0x8] sm:$0xff]  ;;  %v2636_v29 = vld [vmem:[%s2600_s3 + $0x10] sm:$0xff] }
  0x34   : > { %493 = vmatpush.msra.mxu0 %v297_v8  ;;  %654 = vmatpush.msra.mxu1 %v298_v9  ;;  %v332_v25 = vld [vmem:[%s2576_s27 + $0x160] sm:$0xff]  ;;  %v305_v30 = vld [vmem:[%s2576_s27 + $0x88] sm:$0xff]  ;;  %v327_v31 = vld [vmem:[%s2576_s27 + $0x138] sm:$0xff]  ;;  %p2427_p2 = pnand %p2426_p6, %p2542_p11 }
  0x35   : > { %2288 = vmatpush.msra.mxu2 %v294_v10  ;;  %2296 = vmatpush.msra.mxu3 %v295_v11  ;;  %v328_v32 = vld [vmem:[%s2576_s27 + $0x140] sm:$0xff]  ;;  %v329_v33 = vld [vmem:[%s2576_s27 + $0x148] sm:$0xff]  ;;  %v219_v34 = vld [vmem:[%s2600_s3 + $0xd8] sm:$0xff] }
  0x36   : > { %494 = vmatpush.msra.mxu0 %v294_v10  ;;  %655 = vmatpush.msra.mxu1 %v295_v11  ;;  %v2650_v35 = vld [vmem:[%s2600_s3 + $0x18] sm:$0xff]  ;;  %v220_v36 = vld [vmem:[%s2600_s3 + $0xe0] sm:$0xff]  ;;  %v221_v38 = vld [vmem:[%s2600_s3 + $0xe8] sm:$0xff]  ;;  %p2428_p3 = pneg %p2427_p2 }
  0x37   : > { %2289 = vmatpush.msra.mxu2 %v291_v12  ;;  %2297 = vmatpush.msra.mxu3 %v292_v13  ;;  %v2660_v37 = vld [vmem:[%s2600_s3 + $0x20] sm:$0xff]  ;;  %v2670_v39 = vld [vmem:[%s2600_s3 + $0x28] sm:$0xff]  ;;  %v302_v40 = vld [vmem:[%s2576_s27 + $0x70] sm:$0xff] }
  0x38   : > { %495 = vmatpush.msra.mxu0 %v291_v12  ;;  %656 = vmatpush.msra.mxu1 %v292_v13  ;;  %v324_v41 = vld [vmem:[%s2576_s27 + $0x120] sm:$0xff]  ;;  %v325_v42 = vld [vmem:[%s2576_s27 + $0x128] sm:$0xff]  ;;  %v326_v43 = vld [vmem:[%s2576_s27 + $0x130] sm:$0xff] }
  0x39   : > { %2290 = vmatpush.msra.mxu2 %v288_v14  ;;  %2298 = vmatpush.msra.mxu3 %v289_v15  ;;  %v222_v44 = vld [vmem:[%s2600_s3 + $0xf0] sm:$0xff]  ;;  %v223_v46 = vld [vmem:[%s2600_s3 + $0xf8] sm:$0xff]  ;;  %v224_v48 = vld [vmem:[%s2600_s3 + $0x100] sm:$0xff] }
  0x3a   : > { %2014 = vmatmul.msk.f32.vlgmr.msra.gmra.mxu2 %vm336_vm0, %v216_v16  ;;  %2062 = vmatmul.msk.f32.vlgmr.msra.gmra.mxu3 %vm336_vm0, %v216_v16  ;;  %v2684_v45 = vld [vmem:[%s2600_s3 + $0x30] sm:$0xff]  ;;  %v2694_v47 = vld [vmem:[%s2600_s3 + $0x38] sm:$0xff]  ;;  %v2704_v49 = vld [vmem:[%s2600_s3 + $0x40] sm:$0xff] }
  0x3b   : > { %811 = vmatpush.msrb.mxu2 %v311_v17  ;;  %1116 = vmatpush.msrb.mxu3 %v333_v18  ;;  %v299_v50 = vld [vmem:[%s2576_s27 + $0x58] sm:$0xff]  ;;  %v321_v51 = vld [vmem:[%s2576_s27 + $0x108] sm:$0xff]  ;;  %v322_v52 = vld [vmem:[%s2576_s27 + $0x110] sm:$0xff] }
  0x3c   : > { %496 = vmatpush.msra.mxu0 %v288_v14  ;;  %657 = vmatpush.msra.mxu1 %v289_v15  ;;  %v323_v53 = vld [vmem:[%s2576_s27 + $0x118] sm:$0xff]  ;;  %v225_v54 = vld [vmem:[%s2600_s3 + $0x108] sm:$0xff]  ;;  %v226_v56 = vld [vmem:[%s2600_s3 + $0x110] sm:$0xff] }
  0x3d   : > { %1990 = vmatmul.msk.f32.vlgmr.msra.gmra.mxu0 %vm336_vm0, %v2610_v19  ;;  %2038 = vmatmul.msk.f32.vlgmr.msra.gmra.mxu1 %vm336_vm0, %v2610_v19  ;;  %v2718_v55 = vld [vmem:[%s2600_s3 + $0x48] sm:$0xff]  ;;  %v2728_v57 = vld [vmem:[%s2600_s3 + $0x50] sm:$0xff]  ;;  %v227_v58 = vld [vmem:[%s2600_s3 + $0x118] sm:$0xff] }
  0x3e   : > { %1277 = vmatpush.msrb.mxu0 %v334_v20  ;;  %1438 = vmatpush.msrb.mxu1 %v335_v21  ;;  %v2738_v59 = vld [vmem:[%s2600_s3 + $0x58] sm:$0xff]  ;;  %v296_v60 = vld [vmem:[%s2576_s27 + $0x40] sm:$0xff]  ;;  %v318_v61 = vld [vmem:[%s2576_s27 + $0xf0] sm:$0xff] }
  0x3f   : > { %812 = vmatpush.msrb.mxu2 %v308_v22  ;;  %1117 = vmatpush.msrb.mxu3 %v330_v23  ;;  %v319_v62 = vld [vmem:[%s2576_s27 + $0xf8] sm:$0xff]  ;;  %v320_v63 = vld [vmem:[%s2576_s27 + $0x100] sm:$0xff]  ;;  %v229_v2 = vld [vmem:[%s2600_s3 + $0x128] sm:$0xff] }
  0x40   : > { %1278 = vmatpush.msrb.mxu0 %v331_v24  ;;  %1439 = vmatpush.msrb.mxu1 %v332_v25  ;;  %v228_v0 = vld [vmem:[%s2600_s3 + $0x120] sm:$0xff]  ;;  %v2762_v3 = vld [vmem:[%s2600_s3 + $0x68] sm:$0xff]  ;;  %v230_v4 = vld [vmem:[%s2600_s3 + $0x130] sm:$0xff] }
  0x41   : > { %813 = vmatpush.msrb.mxu2 %v305_v30  ;;  %1118 = vmatpush.msrb.mxu3 %v327_v31  ;;  %v2752_v1 = vld [vmem:[%s2600_s3 + $0x60] sm:$0xff]  ;;  %v2772_v5 = vld [vmem:[%s2600_s3 + $0x70] sm:$0xff]  ;;  %v293_v6 = vld [vmem:[%s2576_s27 + $0x28] sm:$0xff] }
  0x42   : > { %2015 = vmatmul.msk.f32.gmra.mxu2 %vm336_vm0, %v217_v26  ;;  %2063 = vmatmul.msk.f32.gmra.mxu3 %vm336_vm0, %v217_v26  ;;  %v315_v7 = vld [vmem:[%s2576_s27 + $0xd8] sm:$0xff]  ;;  %v316_v9 = vld [vmem:[%s2576_s27 + $0xe0] sm:$0xff]  ;;  %v317_v10 = vld [vmem:[%s2576_s27 + $0xe8] sm:$0xff] }
  0x43   : > { %1279 = vmatpush.msrb.mxu0 %v328_v32  ;;  %1440 = vmatpush.msrb.mxu1 %v329_v33  ;;  %v231_v8 = vld [vmem:[%s2600_s3 + $0x138] sm:$0xff]  ;;  %v232_v12 = vld [vmem:[%s2600_s3 + $0x140] sm:$0xff]  ;;  %v233_v18 = vld [vmem:[%s2600_s3 + $0x148] sm:$0xff] }
  0x44   : > { %814 = vmatpush.msrb.mxu2 %v302_v40  ;;  %1119 = vmatpush.msrb.mxu3 %v324_v41  ;;  %v2786_v11 = vld [vmem:[%s2600_s3 + $0x78] sm:$0xff]  ;;  %v2797_v15 = vld [vmem:[%s2600_s3 + $0x80] sm:$0xff]  ;;  %v2813_v22 = vld [vmem:[%s2600_s3 + $0x88] sm:$0xff] }
  0x45   : > { %1991 = vmatmul.msk.f32.gmra.mxu0 %vm336_vm0, %v2626_v27  ;;  %2039 = vmatmul.msk.f32.gmra.mxu1 %vm336_vm0, %v2626_v27  ;;  %v290_v23 = vld [vmem:[%s2576_s27 + $0x10] sm:$0xff]  ;;  %v312_v24 = vld [vmem:[%s2576_s27 + $0xc0] sm:$0xff]  ;;  %v313_v30 = vld [vmem:[%s2576_s27 + $0xc8] sm:$0xff] }
  0x46   : > { %1280 = vmatpush.msrb.mxu0 %v325_v42  ;;  %1441 = vmatpush.msrb.mxu1 %v326_v43  ;;  %v314_v31 = vld [vmem:[%s2576_s27 + $0xd0] sm:$0xff]  ;;  %v235_v40 = vld [vmem:[%s2600_s3 + $0x158] sm:$0xff]  ;;  %s2429_s27 = scalar_lea.hbm %s3491_s2, 4608 }
  0x47   : > { %815 = vmatpush.msrb.mxu2 %v299_v50  ;;  %1120 = vmatpush.msrb.mxu3 %v321_v51  ;;  %v2845_v43 = vld [vmem:[%s2600_s3 + $0x98] sm:$0xff]  ;;  %p2431_p5 = scmp.lt.s32.totalorder %s2429_s27, %s2425_s23 }
  0x48   : > { %1281 = vmatpush.msrb.mxu0 %v322_v52  ;;  %1442 = vmatpush.msrb.mxu1 %v323_v53  ;;  %v2859_v52 = vld [vmem:[%s2600_s3 + $0xa0] sm:$0xff] }
  0x49   : > { %816 = vmatpush.msrb.mxu2 %v296_v60  ;;  %1121 = vmatpush.msrb.mxu3 %v318_v61  ;;  %v2873_v61 = vld [vmem:[%s2600_s3 + $0xa8] sm:$0xff]  ;;  %p2432_p7 = por %p2431_p5, %p2430_p4 }
  0x4a   : > { %2016 = vmatmul.msk.f32.gmra.mxu2 %vm336_vm0, %v218_v28  ;;  %2064 = vmatmul.msk.f32.gmra.mxu3 %vm336_vm0, %v218_v28  ;;  %v234_v28 = vld [vmem:[%s2600_s3 + $0x150] sm:$0xff] }
  0x4b   : > { %1282 = vmatpush.msrb.mxu0 %v319_v62  ;;  %1443 = vmatpush.msrb.mxu1 %v320_v63  ;;  %p2433_p8 = pnand %p2432_p7, %p2428_p3 }
  0x4c   : > { %817 = vmatpush.msrb.mxu2 %v293_v6  ;;  %1122 = vmatpush.msrb.mxu3 %v315_v7  ;;  %v2887_v6 = vld [vmem:[%s2600_s3 + $0xb0] sm:$0xff] }
  0x4d   : > { %1992 = vmatmul.msk.f32.gmra.mxu0 %vm336_vm0, %v2636_v29  ;;  %2040 = vmatmul.msk.f32.gmra.mxu1 %vm336_vm0, %v2636_v29 }
  0x4e   : > { %1283 = vmatpush.msrb.mxu0 %v316_v9  ;;  %1444 = vmatpush.msrb.mxu1 %v317_v10  ;;  %v239_v9 = vld [vmem:[%s2600_s3 + $0x178] sm:$0xff] }
  0x4f   : > { %818 = vmatpush.msrb.mxu2 %v290_v23  ;;  %1123 = vmatpush.msrb.mxu3 %v312_v24 }
  0x50   : > { %1284 = vmatpush.msrb.mxu0 %v313_v30  ;;  %1445 = vmatpush.msrb.mxu1 %v314_v31 }
  0x52   : > { %2017 = vmatmul.msk.f32.gmra.mxu2 %vm336_vm0, %v219_v34  ;;  %2065 = vmatmul.msk.f32.gmra.mxu3 %vm336_vm0, %v219_v34  ;;  %v2831_v34 = vld [vmem:[%s2600_s3 + $0x90] sm:$0xff] }
  0x55   : > { %1993 = vmatmul.msk.f32.gmra.mxu0 %vm336_vm0, %v2650_v35  ;;  %2041 = vmatmul.msk.f32.gmra.mxu1 %vm336_vm0, %v2650_v35 }
  0x5a   : > { %2018 = vmatmul.msk.f32.gmra.mxu2 %vm336_vm0, %v220_v36  ;;  %2066 = vmatmul.msk.f32.gmra.mxu3 %vm336_vm0, %v220_v36 }
  0x5d   : > { %1994 = vmatmul.msk.f32.gmra.mxu0 %vm336_vm0, %v2660_v37  ;;  %2042 = vmatmul.msk.f32.gmra.mxu1 %vm336_vm0, %v2660_v37 }
  0x62   : > { %2019 = vmatmul.msk.f32.gmra.mxu2 %vm336_vm0, %v221_v38  ;;  %2067 = vmatmul.msk.f32.gmra.mxu3 %vm336_vm0, %v221_v38 }
  0x65   : > { %1995 = vmatmul.msk.f32.gmra.mxu0 %vm336_vm0, %v2670_v39  ;;  %2043 = vmatmul.msk.f32.gmra.mxu1 %vm336_vm0, %v2670_v39 }
  0x6a   : > { %2020 = vmatmul.msk.f32.gmra.mxu2 %vm336_vm0, %v222_v44  ;;  %2068 = vmatmul.msk.f32.gmra.mxu3 %vm336_vm0, %v222_v44 }
  0x6d   : > { %1996 = vmatmul.msk.f32.gmra.mxu0 %vm336_vm0, %v2684_v45  ;;  %2044 = vmatmul.msk.f32.gmra.mxu1 %vm336_vm0, %v2684_v45 }
  0x72   : > { %2021 = vmatmul.msk.f32.gmra.mxu2 %vm336_vm0, %v223_v46  ;;  %2069 = vmatmul.msk.f32.gmra.mxu3 %vm336_vm0, %v223_v46 }
  0x75   : > { %1997 = vmatmul.msk.f32.gmra.mxu0 %vm336_vm0, %v2694_v47  ;;  %2045 = vmatmul.msk.f32.gmra.mxu1 %vm336_vm0, %v2694_v47 }
  0x7a   : > { %2022 = vmatmul.msk.f32.gmra.mxu2 %vm336_vm0, %v224_v48  ;;  %2070 = vmatmul.msk.f32.gmra.mxu3 %vm336_vm0, %v224_v48  ;;  %v236_v48 = vld [vmem:[%s2600_s3 + $0x160] sm:$0xff] }
  0x7d   : > { %1998 = vmatmul.msk.f32.gmra.mxu0 %vm336_vm0, %v2704_v49  ;;  %2046 = vmatmul.msk.f32.gmra.mxu1 %vm336_vm0, %v2704_v49 }
  0x82   : > { %2023 = vmatmul.msk.f32.gmra.mxu2 %vm336_vm0, %v225_v54  ;;  %2071 = vmatmul.msk.f32.gmra.mxu3 %vm336_vm0, %v225_v54 }
  0x85   : > { %1999 = vmatmul.msk.f32.gmra.mxu0 %vm336_vm0, %v2718_v55  ;;  %2047 = vmatmul.msk.f32.gmra.mxu1 %vm336_vm0, %v2718_v55 }
  0x8a   : > { %2024 = vmatmul.msk.f32.gmra.mxu2 %vm336_vm0, %v226_v56  ;;  %2072 = vmatmul.msk.f32.gmra.mxu3 %vm336_vm0, %v226_v56  ;;  %v237_v56 = vld [vmem:[%s2600_s3 + $0x168] sm:$0xff] }
  0x8d   : > { %2000 = vmatmul.msk.f32.gmra.mxu0 %vm336_vm0, %v2728_v57  ;;  %2048 = vmatmul.msk.f32.gmra.mxu1 %vm336_vm0, %v2728_v57 }
  0x92   : > { %2025 = vmatmul.msk.f32.gmra.mxu2 %vm336_vm0, %v227_v58  ;;  %2073 = vmatmul.msk.f32.gmra.mxu3 %vm336_vm0, %v227_v58 }
  0x95   : > { %2001 = vmatmul.msk.f32.gmra.mxu0 %vm336_vm0, %v2738_v59  ;;  %2049 = vmatmul.msk.f32.gmra.mxu1 %vm336_vm0, %v2738_v59 }
  0x9a   : > { %2026 = vmatmul.msk.f32.gmra.mxu2 %vm336_vm0, %v228_v0  ;;  %2074 = vmatmul.msk.f32.gmra.mxu3 %vm336_vm0, %v228_v0  ;;  %v238_v0 = vld [vmem:[%s2600_s3 + $0x170] sm:$0xff] }
  0x9d   : > { %2002 = vmatmul.msk.f32.gmra.mxu0 %vm336_vm0, %v2752_v1  ;;  %2050 = vmatmul.msk.f32.gmra.mxu1 %vm336_vm0, %v2752_v1 }
  0xa2   : > { %2027 = vmatmul.msk.f32.gmra.mxu2 %vm336_vm0, %v229_v2  ;;  %2075 = vmatmul.msk.f32.gmra.mxu3 %vm336_vm0, %v229_v2 }
  0xa5   : > { %2003 = vmatmul.msk.f32.gmra.mxu0 %vm336_vm0, %v2762_v3  ;;  %2051 = vmatmul.msk.f32.gmra.mxu1 %vm336_vm0, %v2762_v3 }
  0xaa   : > { %2028 = vmatmul.msk.f32.gmra.mxu2 %vm336_vm0, %v230_v4  ;;  %2076 = vmatmul.msk.f32.gmra.mxu3 %vm336_vm0, %v230_v4 }
  0xad   : > { %2004 = vmatmul.msk.f32.gmra.mxu0 %vm336_vm0, %v2772_v5  ;;  %2052 = vmatmul.msk.f32.gmra.mxu1 %vm336_vm0, %v2772_v5 }
  0xb2   : > { %2029 = vmatmul.msk.f32.gmra.mxu2 %vm336_vm0, %v231_v8  ;;  %2077 = vmatmul.msk.f32.gmra.mxu3 %vm336_vm0, %v231_v8 }
  0xb5   : > { %2005 = vmatmul.msk.f32.gmra.mxu0 %vm336_vm0, %v2786_v11  ;;  %2053 = vmatmul.msk.f32.gmra.mxu1 %vm336_vm0, %v2786_v11 }
  0xba   : > { %2030 = vmatmul.msk.f32.gmra.mxu2 %vm336_vm0, %v232_v12  ;;  %2078 = vmatmul.msk.f32.gmra.mxu3 %vm336_vm0, %v232_v12  ;;  %v498_v13 = vpop.f32.mrf.mxu0  ;;  %v659_v14 = vpop.f32.mrf.mxu1 }
  0xbb   : > { %1591 = vst [vmem:[%s2799_s5] sm:$0xff] %v498_v13  ;;  %v2901_v13 = vld [vmem:[%s2600_s3 + $0xb8] sm:$0xff] }
  0xbc   : > { %1592 = vst [vmem:[%s2799_s5 + $0x8] sm:$0xff] %v659_v14 }
  0xbd   : > { %v570_v16 = vpop.f32.mrf.mxu2  ;;  %v731_v17 = vpop.f32.mrf.mxu3  ;;  %2006 = vmatmul.msk.f32.gmra.mxu0 %vm336_vm0, %v2797_v15  ;;  %2054 = vmatmul.msk.f32.gmra.mxu1 %vm336_vm0, %v2797_v15 }
  0xbe   : > { %1663 = vst [vmem:[%s2799_s5 + $0x240] sm:$0xff] %v570_v16 }
  0xbf   : > { %1664 = vst [vmem:[%s2799_s5 + $0x248] sm:$0xff] %v731_v17  ;;  %v240_v17 = vld [vmem:[%s2600_s3 + $0x180] sm:$0xff] }
  0xc2   : > { %2031 = vmatmul.msk.f32.gmra.mxu2 %vm336_vm0, %v233_v18  ;;  %2079 = vmatmul.msk.f32.gmra.mxu3 %vm336_vm0, %v233_v18  ;;  %v501_v20 = vpop.f32.mrf.mxu0  ;;  %v662_v21 = vpop.f32.mrf.mxu1 }
  0xc3   : > { %1594 = vst [vmem:[%s2799_s5 + $0x18] sm:$0xff] %v501_v20 }
  0xc4   : > { %1595 = vst [vmem:[%s2799_s5 + $0x20] sm:$0xff] %v662_v21 }
  0xc5   : > { %v573_v25 = vpop.f32.mrf.mxu2  ;;  %v734_v26 = vpop.f32.mrf.mxu3  ;;  %2007 = vmatmul.msk.f32.gmra.mxu0 %vm336_vm0, %v2813_v22  ;;  %2055 = vmatmul.msk.f32.gmra.mxu1 %vm336_vm0, %v2813_v22 }
  0xc6   : > { %1666 = vst [vmem:[%s2799_s5 + $0x258] sm:$0xff] %v573_v25 }
  0xc7   : > { %1667 = vst [vmem:[%s2799_s5 + $0x260] sm:$0xff] %v734_v26 }
  0xca   : > { %2032 = vmatmul.msk.f32.gmra.mxu2 %vm336_vm0, %v234_v28  ;;  %2080 = vmatmul.msk.f32.gmra.mxu3 %vm336_vm0, %v234_v28  ;;  %v504_v32 = vpop.f32.mrf.mxu0  ;;  %v665_v33 = vpop.f32.mrf.mxu1 }
  0xcb   : > { %1597 = vst [vmem:[%s2799_s5 + $0x30] sm:$0xff] %v504_v32 }
  0xcc   : > { %1598 = vst [vmem:[%s2799_s5 + $0x38] sm:$0xff] %v665_v33 }
  0xcd   : > { %v576_v36 = vpop.f32.mrf.mxu2  ;;  %v737_v38 = vpop.f32.mrf.mxu3  ;;  %2008 = vmatmul.msk.f32.gmra.mxu0 %vm336_vm0, %v2831_v34  ;;  %2056 = vmatmul.msk.f32.gmra.mxu1 %vm336_vm0, %v2831_v34 }
  0xce   : > { %1669 = vst [vmem:[%s2799_s5 + $0x270] sm:$0xff] %v576_v36 }
  0xcf   : > { %1670 = vst [vmem:[%s2799_s5 + $0x278] sm:$0xff] %v737_v38 }
  0xd2   : > { %2033 = vmatmul.msk.f32.gmra.mxu2 %vm336_vm0, %v235_v40  ;;  %2081 = vmatmul.msk.f32.gmra.mxu3 %vm336_vm0, %v235_v40  ;;  %v507_v41 = vpop.f32.mrf.mxu0  ;;  %v668_v42 = vpop.f32.mrf.mxu1 }
  0xd3   : > { %1600 = vst [vmem:[%s2799_s5 + $0x48] sm:$0xff] %v507_v41 }
  0xd4   : > { %1601 = vst [vmem:[%s2799_s5 + $0x50] sm:$0xff] %v668_v42 }
  0xd5   : > { %v579_v44 = vpop.f32.mrf.mxu2  ;;  %v740_v46 = vpop.f32.mrf.mxu3  ;;  %2009 = vmatmul.msk.f32.gmra.mxu0 %vm336_vm0, %v2845_v43  ;;  %2057 = vmatmul.msk.f32.gmra.mxu1 %vm336_vm0, %v2845_v43 }
  0xd6   : > { %1672 = vst [vmem:[%s2799_s5 + $0x288] sm:$0xff] %v579_v44 }
  0xd7   : > { %1673 = vst [vmem:[%s2799_s5 + $0x290] sm:$0xff] %v740_v46 }
  0xda   : > { %2034 = vmatmul.msk.f32.gmra.mxu2 %vm336_vm0, %v236_v48  ;;  %2082 = vmatmul.msk.f32.gmra.mxu3 %vm336_vm0, %v236_v48  ;;  %v510_v50 = vpop.f32.mrf.mxu0  ;;  %v671_v51 = vpop.f32.mrf.mxu1 }
  0xdb   : > { %1603 = vst [vmem:[%s2799_s5 + $0x60] sm:$0xff] %v510_v50 }
  0xdc   : > { %1604 = vst [vmem:[%s2799_s5 + $0x68] sm:$0xff] %v671_v51 }
  0xdd   : > { %v582_v53 = vpop.f32.mrf.mxu2  ;;  %v743_v54 = vpop.f32.mrf.mxu3  ;;  %2010 = vmatmul.msk.f32.gmra.mxu0 %vm336_vm0, %v2859_v52  ;;  %2058 = vmatmul.msk.f32.gmra.mxu1 %vm336_vm0, %v2859_v52 }
  0xde   : > { %1675 = vst [vmem:[%s2799_s5 + $0x2a0] sm:$0xff] %v582_v53 }
  0xdf   : > { %1676 = vst [vmem:[%s2799_s5 + $0x2a8] sm:$0xff] %v743_v54 }
  0xe2   : > { %2035 = vmatmul.msk.f32.gmra.mxu2 %vm336_vm0, %v237_v56  ;;  %2083 = vmatmul.msk.f32.gmra.mxu3 %vm336_vm0, %v237_v56  ;;  %v513_v58 = vpop.f32.mrf.mxu0  ;;  %v674_v60 = vpop.f32.mrf.mxu1 }
  0xe3   : > { %1606 = vst [vmem:[%s2799_s5 + $0x78] sm:$0xff] %v513_v58 }
  0xe4   : > { %1607 = vst [vmem:[%s2799_s5 + $0x80] sm:$0xff] %v674_v60 }
  0xe5   : > { %v585_v62 = vpop.f32.mrf.mxu2  ;;  %v746_v63 = vpop.f32.mrf.mxu3  ;;  %2011 = vmatmul.msk.f32.gmra.mxu0 %vm336_vm0, %v2873_v61  ;;  %2059 = vmatmul.msk.f32.gmra.mxu1 %vm336_vm0, %v2873_v61 }
  0xe6   : > { %1678 = vst [vmem:[%s2799_s5 + $0x2b8] sm:$0xff] %v585_v62 }
  0xe7   : > { %1679 = vst [vmem:[%s2799_s5 + $0x2c0] sm:$0xff] %v746_v63 }
  0xea   : > { %2036 = vmatmul.msk.f32.gmra.mxu2 %vm336_vm0, %v238_v0  ;;  %2084 = vmatmul.msk.f32.gmra.mxu3 %vm336_vm0, %v238_v0  ;;  %v516_v2 = vpop.f32.mrf.mxu0  ;;  %v677_v4 = vpop.f32.mrf.mxu1 }
  0xeb   : > { %1609 = vst [vmem:[%s2799_s5 + $0x90] sm:$0xff] %v516_v2 }
  0xec   : > { %1610 = vst [vmem:[%s2799_s5 + $0x98] sm:$0xff] %v677_v4 }
  0xed   : > { %v588_v7 = vpop.f32.mrf.mxu2  ;;  %v749_v8 = vpop.f32.mrf.mxu3  ;;  %2012 = vmatmul.msk.f32.gmra.mxu0 %vm336_vm0, %v2887_v6  ;;  %2060 = vmatmul.msk.f32.gmra.mxu1 %vm336_vm0, %v2887_v6 }
  0xee   : > { %1681 = vst [vmem:[%s2799_s5 + $0x2d0] sm:$0xff] %v588_v7 }
  0xef   : > { %1682 = vst [vmem:[%s2799_s5 + $0x2d8] sm:$0xff] %v749_v8 }
  0xf2   : > { %2037 = vmatmul.msk.f32.gmra.mxu2 %vm336_vm0, %v239_v9  ;;  %2085 = vmatmul.msk.f32.gmra.mxu3 %vm336_vm0, %v239_v9  ;;  %v519_v10 = vpop.f32.mrf.mxu0  ;;  %v680_v12 = vpop.f32.mrf.mxu1 }
  0xf3   : > { %1612 = vst [vmem:[%s2799_s5 + $0xa8] sm:$0xff] %v519_v10 }
  0xf4   : > { %1613 = vst [vmem:[%s2799_s5 + $0xb0] sm:$0xff] %v680_v12 }
  0xf5   : > { %v591_v14 = vpop.f32.mrf.mxu2  ;;  %v752_v16 = vpop.f32.mrf.mxu3  ;;  %2013 = vmatmul.msk.f32.gmra.mxu0 %vm336_vm0, %v2901_v13  ;;  %2061 = vmatmul.msk.f32.gmra.mxu1 %vm336_vm0, %v2901_v13 }
  0xf6   : > { %1684 = vst [vmem:[%s2799_s5 + $0x2e8] sm:$0xff] %v591_v14 }
  0xf7   : > { %1685 = vst [vmem:[%s2799_s5 + $0x2f0] sm:$0xff] %v752_v16 }
  0xfa   : > { %2086 = vmatmul.msk.f32.vlgmr.msrb.gmra.mxu2 %vm336_vm0, %v2610_v19  ;;  %2134 = vmatmul.msk.f32.vlgmr.msrb.gmra.mxu3 %vm336_vm0, %v240_v17  ;;  %v522_v18 = vpop.f32.mrf.mxu0  ;;  %v683_v20 = vpop.f32.mrf.mxu1  ;;  %v241_v19 = vld [vmem:[%s2600_s3 + $0x188] sm:$0xff] }
  0xfb   : > { %1615 = vst [vmem:[%s2799_s5 + $0xc0] sm:$0xff] %v522_v18 }
  0xfc   : > { %1616 = vst [vmem:[%s2799_s5 + $0xc8] sm:$0xff] %v683_v20 }
  0xfd   : > { %v594_v21 = vpop.f32.mrf.mxu2  ;;  %v755_v23 = vpop.f32.mrf.mxu3  ;;  %2182 = vmatmul.msk.f32.vlgmr.msrb.gmra.mxu0 %vm336_vm0, %v240_v17  ;;  %2230 = vmatmul.msk.f32.vlgmr.msrb.gmra.mxu1 %vm336_vm0, %v240_v17 }
  0xfe   : > { %1687 = vst [vmem:[%s2799_s5 + $0x300] sm:$0xff] %v594_v21 }
  0xff   : > { %1688 = vst [vmem:[%s2799_s5 + $0x308] sm:$0xff] %v755_v23 }
 0x102   : > { %2087 = vmatmul.msk.f32.gmra.mxu2 %vm336_vm0, %v2626_v27  ;;  %2135 = vmatmul.msk.f32.gmra.mxu3 %vm336_vm0, %v241_v19  ;;  %v525_v24 = vpop.f32.mrf.mxu0  ;;  %v686_v25 = vpop.f32.mrf.mxu1  ;;  %v242_v27 = vld [vmem:[%s2600_s3 + $0x190] sm:$0xff] }
 0x103   : > { %1618 = vst [vmem:[%s2799_s5 + $0xd8] sm:$0xff] %v525_v24 }
 0x104   : > { %1619 = vst [vmem:[%s2799_s5 + $0xe0] sm:$0xff] %v686_v25 }
 0x105   : > { %v597_v26 = vpop.f32.mrf.mxu2  ;;  %v758_v28 = vpop.f32.mrf.mxu3  ;;  %2183 = vmatmul.msk.f32.gmra.mxu0 %vm336_vm0, %v241_v19  ;;  %2231 = vmatmul.msk.f32.gmra.mxu1 %vm336_vm0, %v241_v19 }
 0x106   : > { %1690 = vst [vmem:[%s2799_s5 + $0x318] sm:$0xff] %v597_v26 }
 0x107   : > { %1691 = vst [vmem:[%s2799_s5 + $0x320] sm:$0xff] %v758_v28 }
 0x10a   : > { %2088 = vmatmul.msk.f32.gmra.mxu2 %vm336_vm0, %v2636_v29  ;;  %2136 = vmatmul.msk.f32.gmra.mxu3 %vm336_vm0, %v242_v27  ;;  %v528_v30 = vpop.f32.mrf.mxu0  ;;  %v689_v31 = vpop.f32.mrf.mxu1  ;;  %v243_v29 = vld [vmem:[%s2600_s3 + $0x198] sm:$0xff] }
 0x10b   : > { %1621 = vst [vmem:[%s2799_s5 + $0xf0] sm:$0xff] %v528_v30 }
 0x10c   : > { %1622 = vst [vmem:[%s2799_s5 + $0xf8] sm:$0xff] %v689_v31 }
 0x10d   : > { %v600_v32 = vpop.f32.mrf.mxu2  ;;  %v761_v33 = vpop.f32.mrf.mxu3  ;;  %2184 = vmatmul.msk.f32.gmra.mxu0 %vm336_vm0, %v242_v27  ;;  %2232 = vmatmul.msk.f32.gmra.mxu1 %vm336_vm0, %v242_v27 }
 0x10e   : > { %1693 = vst [vmem:[%s2799_s5 + $0x330] sm:$0xff] %v600_v32 }
 0x10f   : > { %1694 = vst [vmem:[%s2799_s5 + $0x338] sm:$0xff] %v761_v33 }
 0x112   : > { %2089 = vmatmul.msk.f32.gmra.mxu2 %vm336_vm0, %v2650_v35  ;;  %2137 = vmatmul.msk.f32.gmra.mxu3 %vm336_vm0, %v243_v29  ;;  %v531_v36 = vpop.f32.mrf.mxu0  ;;  %v692_v38 = vpop.f32.mrf.mxu1  ;;  %v244_v35 = vld [vmem:[%s2600_s3 + $0x1a0] sm:$0xff] }
 0x113   : > { %1624 = vst [vmem:[%s2799_s5 + $0x108] sm:$0xff] %v531_v36 }
 0x114   : > { %1625 = vst [vmem:[%s2799_s5 + $0x110] sm:$0xff] %v692_v38 }
 0x115   : > { %v603_v40 = vpop.f32.mrf.mxu2  ;;  %v764_v41 = vpop.f32.mrf.mxu3  ;;  %2185 = vmatmul.msk.f32.gmra.mxu0 %vm336_vm0, %v243_v29  ;;  %2233 = vmatmul.msk.f32.gmra.mxu1 %vm336_vm0, %v243_v29 }
 0x116   : > { %1696 = vst [vmem:[%s2799_s5 + $0x348] sm:$0xff] %v603_v40 }
 0x117   : > { %1697 = vst [vmem:[%s2799_s5 + $0x350] sm:$0xff] %v764_v41 }
 0x11a   : > { %2090 = vmatmul.msk.f32.gmra.mxu2 %vm336_vm0, %v2660_v37  ;;  %2138 = vmatmul.msk.f32.gmra.mxu3 %vm336_vm0, %v244_v35  ;;  %v534_v42 = vpop.f32.mrf.mxu0  ;;  %v695_v44 = vpop.f32.mrf.mxu1  ;;  %v245_v37 = vld [vmem:[%s2600_s3 + $0x1a8] sm:$0xff] }
 0x11b   : > { %1627 = vst [vmem:[%s2799_s5 + $0x120] sm:$0xff] %v534_v42 }
 0x11c   : > { %1628 = vst [vmem:[%s2799_s5 + $0x128] sm:$0xff] %v695_v44 }
 0x11d   : > { %v606_v46 = vpop.f32.mrf.mxu2  ;;  %v767_v48 = vpop.f32.mrf.mxu3  ;;  %2186 = vmatmul.msk.f32.gmra.mxu0 %vm336_vm0, %v244_v35  ;;  %2234 = vmatmul.msk.f32.gmra.mxu1 %vm336_vm0, %v244_v35 }
 0x11e   : > { %1699 = vst [vmem:[%s2799_s5 + $0x360] sm:$0xff] %v606_v46 }
 0x11f   : > { %1700 = vst [vmem:[%s2799_s5 + $0x368] sm:$0xff] %v767_v48 }
 0x122   : > { %2091 = vmatmul.msk.f32.gmra.mxu2 %vm336_vm0, %v2670_v39  ;;  %2139 = vmatmul.msk.f32.gmra.mxu3 %vm336_vm0, %v245_v37  ;;  %v537_v50 = vpop.f32.mrf.mxu0  ;;  %v698_v51 = vpop.f32.mrf.mxu1  ;;  %v246_v39 = vld [vmem:[%s2600_s3 + $0x1b0] sm:$0xff] }
 0x123   : > { %1630 = vst [vmem:[%s2799_s5 + $0x138] sm:$0xff] %v537_v50 }
 0x124   : > { %1631 = vst [vmem:[%s2799_s5 + $0x140] sm:$0xff] %v698_v51 }
 0x125   : > { %v609_v53 = vpop.f32.mrf.mxu2  ;;  %v770_v54 = vpop.f32.mrf.mxu3  ;;  %2187 = vmatmul.msk.f32.gmra.mxu0 %vm336_vm0, %v245_v37  ;;  %2235 = vmatmul.msk.f32.gmra.mxu1 %vm336_vm0, %v245_v37 }
 0x126   : > { %1702 = vst [vmem:[%s2799_s5 + $0x378] sm:$0xff] %v609_v53 }
 0x127   : > { %1703 = vst [vmem:[%s2799_s5 + $0x380] sm:$0xff] %v770_v54 }
 0x12a   : > { %2092 = vmatmul.msk.f32.gmra.mxu2 %vm336_vm0, %v2684_v45  ;;  %2140 = vmatmul.msk.f32.gmra.mxu3 %vm336_vm0, %v246_v39  ;;  %v540_v56 = vpop.f32.mrf.mxu0  ;;  %v701_v58 = vpop.f32.mrf.mxu1  ;;  %v247_v45 = vld [vmem:[%s2600_s3 + $0x1b8] sm:$0xff] }
 0x12b   : > { %1633 = vst [vmem:[%s2799_s5 + $0x150] sm:$0xff] %v540_v56 }
 0x12c   : > { %1634 = vst [vmem:[%s2799_s5 + $0x158] sm:$0xff] %v701_v58 }
 0x12d   : > { %v612_v60 = vpop.f32.mrf.mxu2  ;;  %v773_v62 = vpop.f32.mrf.mxu3  ;;  %2188 = vmatmul.msk.f32.gmra.mxu0 %vm336_vm0, %v246_v39  ;;  %2236 = vmatmul.msk.f32.gmra.mxu1 %vm336_vm0, %v246_v39 }
 0x12e   : > { %1705 = vst [vmem:[%s2799_s5 + $0x390] sm:$0xff] %v612_v60 }
 0x12f   : > { %1706 = vst [vmem:[%s2799_s5 + $0x398] sm:$0xff] %v773_v62 }
 0x132   : > { %2093 = vmatmul.msk.f32.gmra.mxu2 %vm336_vm0, %v2694_v47  ;;  %2141 = vmatmul.msk.f32.gmra.mxu3 %vm336_vm0, %v247_v45  ;;  %v543_v63 = vpop.f32.mrf.mxu0  ;;  %v704_v0 = vpop.f32.mrf.mxu1  ;;  %v248_v47 = vld [vmem:[%s2600_s3 + $0x1c0] sm:$0xff] }
 0x133   : > { %1636 = vst [vmem:[%s2799_s5 + $0x168] sm:$0xff] %v543_v63 }
 0x134   : > { %1637 = vst [vmem:[%s2799_s5 + $0x170] sm:$0xff] %v704_v0 }
 0x135   : > { %v615_v2 = vpop.f32.mrf.mxu2  ;;  %v776_v4 = vpop.f32.mrf.mxu3  ;;  %2189 = vmatmul.msk.f32.gmra.mxu0 %vm336_vm0, %v247_v45  ;;  %2237 = vmatmul.msk.f32.gmra.mxu1 %vm336_vm0, %v247_v45 }
 0x136   : > { %1708 = vst [vmem:[%s2799_s5 + $0x3a8] sm:$0xff] %v615_v2 }
 0x137   : > { %1709 = vst [vmem:[%s2799_s5 + $0x3b0] sm:$0xff] %v776_v4 }
 0x13a   : > { %2094 = vmatmul.msk.f32.gmra.mxu2 %vm336_vm0, %v2704_v49  ;;  %2142 = vmatmul.msk.f32.gmra.mxu3 %vm336_vm0, %v248_v47  ;;  %v546_v7 = vpop.f32.mrf.mxu0  ;;  %v707_v8 = vpop.f32.mrf.mxu1  ;;  %v249_v49 = vld [vmem:[%s2600_s3 + $0x1c8] sm:$0xff] }
 0x13b   : > { %1639 = vst [vmem:[%s2799_s5 + $0x180] sm:$0xff] %v546_v7 }
 0x13c   : > { %1640 = vst [vmem:[%s2799_s5 + $0x188] sm:$0xff] %v707_v8 }
 0x13d   : > { %v618_v9 = vpop.f32.mrf.mxu2  ;;  %v779_v10 = vpop.f32.mrf.mxu3  ;;  %2190 = vmatmul.msk.f32.gmra.mxu0 %vm336_vm0, %v248_v47  ;;  %2238 = vmatmul.msk.f32.gmra.mxu1 %vm336_vm0, %v248_v47 }
 0x13e   : > { %1711 = vst [vmem:[%s2799_s5 + $0x3c0] sm:$0xff] %v618_v9 }
 0x13f   : > { %1712 = vst [vmem:[%s2799_s5 + $0x3c8] sm:$0xff] %v779_v10 }
 0x142   : > { %2095 = vmatmul.msk.f32.gmra.mxu2 %vm336_vm0, %v2718_v55  ;;  %2143 = vmatmul.msk.f32.gmra.mxu3 %vm336_vm0, %v249_v49  ;;  %v549_v12 = vpop.f32.mrf.mxu0  ;;  %v710_v14 = vpop.f32.mrf.mxu1  ;;  %v250_v55 = vld [vmem:[%s2600_s3 + $0x1d0] sm:$0xff] }
 0x143   : > { %1642 = vst [vmem:[%s2799_s5 + $0x198] sm:$0xff] %v549_v12 }
 0x144   : > { %1643 = vst [vmem:[%s2799_s5 + $0x1a0] sm:$0xff] %v710_v14 }
 0x145   : > { %v621_v16 = vpop.f32.mrf.mxu2  ;;  %v782_v17 = vpop.f32.mrf.mxu3  ;;  %2191 = vmatmul.msk.f32.gmra.mxu0 %vm336_vm0, %v249_v49  ;;  %2239 = vmatmul.msk.f32.gmra.mxu1 %vm336_vm0, %v249_v49 }
 0x146   : > { %1714 = vst [vmem:[%s2799_s5 + $0x3d8] sm:$0xff] %v621_v16 }
 0x147   : > { %1715 = vst [vmem:[%s2799_s5 + $0x3e0] sm:$0xff] %v782_v17 }
 0x14a   : > { %2096 = vmatmul.msk.f32.gmra.mxu2 %vm336_vm0, %v2728_v57  ;;  %2144 = vmatmul.msk.f32.gmra.mxu3 %vm336_vm0, %v250_v55  ;;  %v552_v18 = vpop.f32.mrf.mxu0  ;;  %v713_v20 = vpop.f32.mrf.mxu1  ;;  %v251_v57 = vld [vmem:[%s2600_s3 + $0x1d8] sm:$0xff] }
 0x14b   : > { %1645 = vst [vmem:[%s2799_s5 + $0x1b0] sm:$0xff] %v552_v18 }
 0x14c   : > { %1646 = vst [vmem:[%s2799_s5 + $0x1b8] sm:$0xff] %v713_v20 }
 0x14d   : > { %v624_v21 = vpop.f32.mrf.mxu2  ;;  %v785_v23 = vpop.f32.mrf.mxu3  ;;  %2192 = vmatmul.msk.f32.gmra.mxu0 %vm336_vm0, %v250_v55  ;;  %2240 = vmatmul.msk.f32.gmra.mxu1 %vm336_vm0, %v250_v55 }
 0x14e   : > { %1717 = vst [vmem:[%s2799_s5 + $0x3f0] sm:$0xff] %v624_v21 }
 0x14f   : > { %1718 = vst [vmem:[%s2799_s5 + $0x3f8] sm:$0xff] %v785_v23 }
 0x152   : > { %2097 = vmatmul.msk.f32.gmra.mxu2 %vm336_vm0, %v2738_v59  ;;  %2145 = vmatmul.msk.f32.gmra.mxu3 %vm336_vm0, %v251_v57  ;;  %v555_v19 = vpop.f32.mrf.mxu0  ;;  %v716_v24 = vpop.f32.mrf.mxu1  ;;  %v252_v59 = vld [vmem:[%s2600_s3 + $0x1e0] sm:$0xff] }
 0x153   : > { %1648 = vst [vmem:[%s2799_s5 + $0x1c8] sm:$0xff] %v555_v19 }
 0x154   : > { %1649 = vst [vmem:[%s2799_s5 + $0x1d0] sm:$0xff] %v716_v24  ;;  %v2355_v24 = vld [vmem:[%s2600_s3 + $0xc0] sm:$0xff] }
 0x155   : > { %v627_v25 = vpop.f32.mrf.mxu2  ;;  %v788_v26 = vpop.f32.mrf.mxu3  ;;  %2193 = vmatmul.msk.f32.gmra.mxu0 %vm336_vm0, %v251_v57  ;;  %2241 = vmatmul.msk.f32.gmra.mxu1 %vm336_vm0, %v251_v57 }
 0x156   : > { %1720 = vst [vmem:[%s2799_s5 + $0x408] sm:$0xff] %v627_v25 }
 0x157   : > { %1721 = vst [vmem:[%s2799_s5 + $0x410] sm:$0xff] %v788_v26 }
 0x15a   : > { %2098 = vmatmul.msk.f32.gmra.mxu2 %vm336_vm0, %v2752_v1  ;;  %2146 = vmatmul.msk.f32.gmra.mxu3 %vm336_vm0, %v252_v59  ;;  %v558_v28 = vpop.f32.mrf.mxu0  ;;  %v719_v27 = vpop.f32.mrf.mxu1  ;;  %v253_v1 = vld [vmem:[%s2600_s3 + $0x1e8] sm:$0xff] }
 0x15b   : > { %1651 = vst [vmem:[%s2799_s5 + $0x1e0] sm:$0xff] %v558_v28 }
 0x15c   : > { %1652 = vst [vmem:[%s2799_s5 + $0x1e8] sm:$0xff] %v719_v27  ;;  %v265_v27 = vld [vmem:[%s2600_s3 + $0x248] sm:$0xff] }
 0x15d   : > { %v630_v30 = vpop.f32.mrf.mxu2  ;;  %v791_v31 = vpop.f32.mrf.mxu3  ;;  %2194 = vmatmul.msk.f32.gmra.mxu0 %vm336_vm0, %v252_v59  ;;  %2242 = vmatmul.msk.f32.gmra.mxu1 %vm336_vm0, %v252_v59 }
 0x15e   : > { %1723 = vst [vmem:[%s2799_s5 + $0x420] sm:$0xff] %v630_v30  ;;  %v2356_v30 = vld [vmem:[%s2600_s3 + $0xc8] sm:$0xff] }
 0x15f   : > { %1724 = vst [vmem:[%s2799_s5 + $0x428] sm:$0xff] %v791_v31 }
 0x162   : > { %2099 = vmatmul.msk.f32.gmra.mxu2 %vm336_vm0, %v2762_v3  ;;  %2147 = vmatmul.msk.f32.gmra.mxu3 %vm336_vm0, %v253_v1  ;;  %v561_v32 = vpop.f32.mrf.mxu0  ;;  %v722_v33 = vpop.f32.mrf.mxu1  ;;  %v254_v3 = vld [vmem:[%s2600_s3 + $0x1f0] sm:$0xff] }
 0x163   : > { %1654 = vst [vmem:[%s2799_s5 + $0x1f8] sm:$0xff] %v561_v32 }
 0x164   : > { %1655 = vst [vmem:[%s2799_s5 + $0x200] sm:$0xff] %v722_v33 }
 0x165   : > { %v633_v29 = vpop.f32.mrf.mxu2  ;;  %v794_v36 = vpop.f32.mrf.mxu3  ;;  %2195 = vmatmul.msk.f32.gmra.mxu0 %vm336_vm0, %v253_v1  ;;  %2243 = vmatmul.msk.f32.gmra.mxu1 %vm336_vm0, %v253_v1 }
 0x166   : > { %1726 = vst [vmem:[%s2799_s5 + $0x438] sm:$0xff] %v633_v29  ;;  %v266_v29 = vld [vmem:[%s2600_s3 + $0x250] sm:$0xff] }
 0x167   : > { %1727 = vst [vmem:[%s2799_s5 + $0x440] sm:$0xff] %v794_v36  ;;  %v2357_v36 = vld [vmem:[%s2600_s3 + $0xd0] sm:$0xff] }
 0x16a   : > { %2100 = vmatmul.msk.f32.gmra.mxu2 %vm336_vm0, %v2772_v5  ;;  %2148 = vmatmul.msk.f32.gmra.mxu3 %vm336_vm0, %v254_v3  ;;  %v564_v38 = vpop.f32.mrf.mxu0  ;;  %v725_v40 = vpop.f32.mrf.mxu1  ;;  %v255_v5 = vld [vmem:[%s2600_s3 + $0x1f8] sm:$0xff] }
 0x16b   : > { %1657 = vst [vmem:[%s2799_s5 + $0x210] sm:$0xff] %v564_v38 }
 0x16c   : > { %1658 = vst [vmem:[%s2799_s5 + $0x218] sm:$0xff] %v725_v40 }
 0x16d   : > { %v636_v41 = vpop.f32.mrf.mxu2  ;;  %v797_v35 = vpop.f32.mrf.mxu3  ;;  %2196 = vmatmul.msk.f32.gmra.mxu0 %vm336_vm0, %v254_v3  ;;  %2244 = vmatmul.msk.f32.gmra.mxu1 %vm336_vm0, %v254_v3 }
 0x16e   : > { %1729 = vst [vmem:[%s2799_s5 + $0x450] sm:$0xff] %v636_v41 }
 0x16f   : > { %1730 = vst [vmem:[%s2799_s5 + $0x458] sm:$0xff] %v797_v35  ;;  %v267_v35 = vld [vmem:[%s2600_s3 + $0x258] sm:$0xff] }
 0x172   : > { %2101 = vmatmul.msk.f32.gmra.mxu2 %vm336_vm0, %v2786_v11  ;;  %2149 = vmatmul.msk.f32.gmra.mxu3 %vm336_vm0, %v255_v5  ;;  %v567_v42 = vpop.f32.mrf.mxu0  ;;  %v728_v44 = vpop.f32.mrf.mxu1  ;;  %v256_v11 = vld [vmem:[%s2600_s3 + $0x200] sm:$0xff] }
 0x173   : > { %1660 = vst [vmem:[%s2799_s5 + $0x228] sm:$0xff] %v567_v42 }
 0x174   : > { %1661 = vst [vmem:[%s2799_s5 + $0x230] sm:$0xff] %v728_v44 }
 0x175   : > { %v639_v46 = vpop.f32.mrf.mxu2  ;;  %v800_v48 = vpop.f32.mrf.mxu3  ;;  %2197 = vmatmul.msk.f32.gmra.mxu0 %vm336_vm0, %v255_v5  ;;  %2245 = vmatmul.msk.f32.gmra.mxu1 %vm336_vm0, %v255_v5  ;;  %v2358_v5 = vld [vmem:[%s2600_s3 + $0xd8] sm:$0xff] }
 0x176   : > { %1732 = vst [vmem:[%s2799_s5 + $0x468] sm:$0xff] %v639_v46 }
 0x177   : > { %1733 = vst [vmem:[%s2799_s5 + $0x470] sm:$0xff] %v800_v48 }
 0x17a   : > { %2102 = vmatmul.msk.f32.gmra.mxu2 %vm336_vm0, %v2797_v15  ;;  %2150 = vmatmul.msk.f32.gmra.mxu3 %vm336_vm0, %v256_v11  ;;  %v1286_v37 = vpop.f32.mrf.mxu0  ;;  %v1447_v50 = vpop.f32.mrf.mxu1  ;;  %v257_v15 = vld [vmem:[%s2600_s3 + $0x208] sm:$0xff] }
 0x17b   : > { %1736 = vst [vmem:[%s2799_s5 + $0x488] sm:$0xff] %v1286_v37  ;;  %v2359_v37 = vld [vmem:[%s2600_s3 + $0xe0] sm:$0xff] }
 0x17c   : > { %1737 = vst [vmem:[%s2799_s5 + $0x490] sm:$0xff] %v1447_v50 }
 0x17d   : > { %v820_v51 = vpop.f32.mrf.mxu2  ;;  %v1125_v53 = vpop.f32.mrf.mxu3  ;;  %2198 = vmatmul.msk.f32.gmra.mxu0 %vm336_vm0, %v256_v11  ;;  %2246 = vmatmul.msk.f32.gmra.mxu1 %vm336_vm0, %v256_v11  ;;  %v268_v11 = vld [vmem:[%s2600_s3 + $0x260] sm:$0xff] }
 0x17e   : > { %1593 = vst [vmem:[%s2799_s5 + $0x10] sm:$0xff] %v820_v51 }
 0x17f   : > { %1735 = vst [vmem:[%s2799_s5 + $0x480] sm:$0xff] %v1125_v53 }
 0x182   : > { %2103 = vmatmul.msk.f32.gmra.mxu2 %vm336_vm0, %v2813_v22  ;;  %2151 = vmatmul.msk.f32.gmra.mxu3 %vm336_vm0, %v257_v15  ;;  %v1289_v54 = vpop.f32.mrf.mxu0  ;;  %v1450_v39 = vpop.f32.mrf.mxu1  ;;  %v258_v22 = vld [vmem:[%s2600_s3 + $0x210] sm:$0xff] }
 0x183   : > { %1739 = vst [vmem:[%s2799_s5 + $0x4a0] sm:$0xff] %v1289_v54  ;;  %v269_v54 = vld [vmem:[%s2600_s3 + $0x268] sm:$0xff] }
 0x184   : > { %1740 = vst [vmem:[%s2799_s5 + $0x4a8] sm:$0xff] %v1450_v39  ;;  %v2360_v39 = vld [vmem:[%s2600_s3 + $0xe8] sm:$0xff] }
 0x185   : > { %v823_v56 = vpop.f32.mrf.mxu2  ;;  %v1128_v58 = vpop.f32.mrf.mxu3  ;;  %2199 = vmatmul.msk.f32.gmra.mxu0 %vm336_vm0, %v257_v15  ;;  %2247 = vmatmul.msk.f32.gmra.mxu1 %vm336_vm0, %v257_v15 }
 0x186   : > { %1596 = vst [vmem:[%s2799_s5 + $0x28] sm:$0xff] %v823_v56 }
 0x187   : > { %1738 = vst [vmem:[%s2799_s5 + $0x498] sm:$0xff] %v1128_v58 }
 0x18a   : > { %2104 = vmatmul.msk.f32.gmra.mxu2 %vm336_vm0, %v2831_v34  ;;  %2152 = vmatmul.msk.f32.gmra.mxu3 %vm336_vm0, %v258_v22  ;;  %v1292_v60 = vpop.f32.mrf.mxu0  ;;  %v1453_v62 = vpop.f32.mrf.mxu1  ;;  %v259_v34 = vld [vmem:[%s2600_s3 + $0x218] sm:$0xff] }
 0x18b   : > { %1742 = vst [vmem:[%s2799_s5 + $0x4b8] sm:$0xff] %v1292_v60 }
 0x18c   : > { %1743 = vst [vmem:[%s2799_s5 + $0x4c0] sm:$0xff] %v1453_v62  ;;  %v270_v62 = vld [vmem:[%s2600_s3 + $0x270] sm:$0xff] }
 0x18d   : > { %v826_v45 = vpop.f32.mrf.mxu2  ;;  %v1131_v63 = vpop.f32.mrf.mxu3  ;;  %2200 = vmatmul.msk.f32.gmra.mxu0 %vm336_vm0, %v258_v22  ;;  %2248 = vmatmul.msk.f32.gmra.mxu1 %vm336_vm0, %v258_v22 }
 0x18e   : > { %1599 = vst [vmem:[%s2799_s5 + $0x40] sm:$0xff] %v826_v45  ;;  %v2361_v45 = vld [vmem:[%s2600_s3 + $0xf0] sm:$0xff] }
 0x18f   : > { %1741 = vst [vmem:[%s2799_s5 + $0x4b0] sm:$0xff] %v1131_v63 }
 0x192   : > { %2105 = vmatmul.msk.f32.gmra.mxu2 %vm336_vm0, %v2845_v43  ;;  %2153 = vmatmul.msk.f32.gmra.mxu3 %vm336_vm0, %v259_v34  ;;  %v1295_v0 = vpop.f32.mrf.mxu0  ;;  %v1456_v2 = vpop.f32.mrf.mxu1  ;;  %v260_v43 = vld [vmem:[%s2600_s3 + $0x220] sm:$0xff] }
 0x193   : > { %1745 = vst [vmem:[%s2799_s5 + $0x4d0] sm:$0xff] %v1295_v0 }
 0x194   : > { %1746 = vst [vmem:[%s2799_s5 + $0x4d8] sm:$0xff] %v1456_v2 }
 0x195   : > { %v829_v4 = vpop.f32.mrf.mxu2  ;;  %v1134_v47 = vpop.f32.mrf.mxu3  ;;  %2201 = vmatmul.msk.f32.gmra.mxu0 %vm336_vm0, %v259_v34  ;;  %2249 = vmatmul.msk.f32.gmra.mxu1 %vm336_vm0, %v259_v34 }
 0x196   : > { %1602 = vst [vmem:[%s2799_s5 + $0x58] sm:$0xff] %v829_v4  ;;  %v271_v4 = vld [vmem:[%s2600_s3 + $0x278] sm:$0xff] }
 0x197   : > { %1744 = vst [vmem:[%s2799_s5 + $0x4c8] sm:$0xff] %v1134_v47  ;;  %v2362_v47 = vld [vmem:[%s2600_s3 + $0xf8] sm:$0xff] }
 0x19a   : > { %2106 = vmatmul.msk.f32.gmra.mxu2 %vm336_vm0, %v2859_v52  ;;  %2154 = vmatmul.msk.f32.gmra.mxu3 %vm336_vm0, %v260_v43  ;;  %v1298_v7 = vpop.f32.mrf.mxu0  ;;  %v1459_v8 = vpop.f32.mrf.mxu1  ;;  %v261_v52 = vld [vmem:[%s2600_s3 + $0x228] sm:$0xff] }
 0x19b   : > { %1748 = vst [vmem:[%s2799_s5 + $0x4e8] sm:$0xff] %v1298_v7 }
 0x19c   : > { %1749 = vst [vmem:[%s2799_s5 + $0x4f0] sm:$0xff] %v1459_v8 }
 0x19d   : > { %v832_v9 = vpop.f32.mrf.mxu2  ;;  %v1137_v10 = vpop.f32.mrf.mxu3  ;;  %2202 = vmatmul.msk.f32.gmra.mxu0 %vm336_vm0, %v260_v43  ;;  %2250 = vmatmul.msk.f32.gmra.mxu1 %vm336_vm0, %v260_v43 }
 0x19e   : > { %1605 = vst [vmem:[%s2799_s5 + $0x70] sm:$0xff] %v832_v9 }
 0x19f   : > { %1747 = vst [vmem:[%s2799_s5 + $0x4e0] sm:$0xff] %v1137_v10  ;;  %v272_v10 = vld [vmem:[%s2600_s3 + $0x280] sm:$0xff] }
 0x1a2   : > { %2107 = vmatmul.msk.f32.gmra.mxu2 %vm336_vm0, %v2873_v61  ;;  %2155 = vmatmul.msk.f32.gmra.mxu3 %vm336_vm0, %v261_v52  ;;  %v1301_v49 = vpop.f32.mrf.mxu0  ;;  %v1462_v12 = vpop.f32.mrf.mxu1  ;;  %v262_v61 = vld [vmem:[%s2600_s3 + $0x230] sm:$0xff] }
 0x1a3   : > { %1751 = vst [vmem:[%s2799_s5 + $0x500] sm:$0xff] %v1301_v49 }
 0x1a4   : > { %1752 = vst [vmem:[%s2799_s5 + $0x508] sm:$0xff] %v1462_v12 }
 0x1a5   : > { %v835_v14 = vpop.f32.mrf.mxu2  ;;  %v1140_v16 = vpop.f32.mrf.mxu3  ;;  %2203 = vmatmul.msk.f32.gmra.mxu0 %vm336_vm0, %v261_v52  ;;  %2251 = vmatmul.msk.f32.gmra.mxu1 %vm336_vm0, %v261_v52  ;;  %v2363_v52 = vld [vmem:[%s2600_s3 + $0x100] sm:$0xff] }
 0x1a6   : > { %1608 = vst [vmem:[%s2799_s5 + $0x88] sm:$0xff] %v835_v14 }
 0x1a7   : > { %1750 = vst [vmem:[%s2799_s5 + $0x4f8] sm:$0xff] %v1140_v16 }
 0x1aa   : > { %2108 = vmatmul.msk.f32.gmra.mxu2 %vm336_vm0, %v2887_v6  ;;  %2156 = vmatmul.msk.f32.gmra.mxu3 %vm336_vm0, %v262_v61  ;;  %v1304_v17 = vpop.f32.mrf.mxu0  ;;  %v1465_v55 = vpop.f32.mrf.mxu1  ;;  %v263_v6 = vld [vmem:[%s2600_s3 + $0x238] sm:$0xff] }
 0x1ab   : > { %1754 = vst [vmem:[%s2799_s5 + $0x518] sm:$0xff] %v1304_v17  ;;  %v2364_v17 = vld [vmem:[%s2600_s3 + $0x108] sm:$0xff] }
 0x1ac   : > { %1755 = vst [vmem:[%s2799_s5 + $0x520] sm:$0xff] %v1465_v55 }
 0x1ad   : > { %v838_v18 = vpop.f32.mrf.mxu2  ;;  %v1143_v20 = vpop.f32.mrf.mxu3  ;;  %2204 = vmatmul.msk.f32.gmra.mxu0 %vm336_vm0, %v262_v61  ;;  %2252 = vmatmul.msk.f32.gmra.mxu1 %vm336_vm0, %v262_v61  ;;  %v273_v61 = vld [vmem:[%s2600_s3 + $0x288] sm:$0xff] }
 0x1ae   : > { %1611 = vst [vmem:[%s2799_s5 + $0xa0] sm:$0xff] %v838_v18 }
 0x1af   : > { %1753 = vst [vmem:[%s2799_s5 + $0x510] sm:$0xff] %v1143_v20 }
 0x1b2   : > { %2109 = vmatmul.msk.f32.gmra.mxu2 %vm336_vm0, %v2901_v13  ;;  %2157 = vmatmul.msk.f32.gmra.mxu3 %vm336_vm0, %v263_v6  ;;  %v1307_v21 = vpop.f32.mrf.mxu0  ;;  %v1468_v23 = vpop.f32.mrf.mxu1  ;;  %v264_v13 = vld [vmem:[%s2600_s3 + $0x240] sm:$0xff] }
 0x1b3   : > { %1757 = vst [vmem:[%s2799_s5 + $0x530] sm:$0xff] %v1307_v21  ;;  %v274_v21 = vld [vmem:[%s2600_s3 + $0x290] sm:$0xff] }
 0x1b4   : > { %1758 = vst [vmem:[%s2799_s5 + $0x538] sm:$0xff] %v1468_v23  ;;  %v2365_v23 = vld [vmem:[%s2600_s3 + $0x110] sm:$0xff] }
 0x1b5   : > { %v841_v57 = vpop.f32.mrf.mxu2  ;;  %v1146_v19 = vpop.f32.mrf.mxu3  ;;  %2205 = vmatmul.msk.f32.gmra.mxu0 %vm336_vm0, %v263_v6  ;;  %2253 = vmatmul.msk.f32.gmra.mxu1 %vm336_vm0, %v263_v6 }
 0x1b6   : > { %1614 = vst [vmem:[%s2799_s5 + $0xb8] sm:$0xff] %v841_v57 }
 0x1b7   : > { %1756 = vst [vmem:[%s2799_s5 + $0x528] sm:$0xff] %v1146_v19 }
 0x1ba   : > { %2110 = vmatmul.msk.f32.gmra.mxu2 %vm336_vm0, %v2355_v24  ;;  %2158 = vmatmul.msk.f32.gmra.mxu3 %vm336_vm0, %v264_v13  ;;  %v1310_v25 = vpop.f32.mrf.mxu0  ;;  %v1471_v26 = vpop.f32.mrf.mxu1 }
 0x1bb   : > { %1760 = vst [vmem:[%s2799_s5 + $0x548] sm:$0xff] %v1310_v25  ;;  %v275_v25 = vld [vmem:[%s2600_s3 + $0x298] sm:$0xff] }
 0x1bc   : > { %1761 = vst [vmem:[%s2799_s5 + $0x550] sm:$0xff] %v1471_v26  ;;  %v2366_v26 = vld [vmem:[%s2600_s3 + $0x118] sm:$0xff] }
 0x1bd   : > { %v844_v59 = vpop.f32.mrf.mxu2  ;;  %v1149_v28 = vpop.f32.mrf.mxu3  ;;  %2206 = vmatmul.msk.f32.gmra.mxu0 %vm336_vm0, %v264_v13  ;;  %2254 = vmatmul.msk.f32.gmra.mxu1 %vm336_vm0, %v264_v13 }
 0x1be   : > { %1617 = vst [vmem:[%s2799_s5 + $0xd0] sm:$0xff] %v844_v59 }
 0x1bf   : > { %1759 = vst [vmem:[%s2799_s5 + $0x540] sm:$0xff] %v1149_v28 }
 0x1c2   : > { %2111 = vmatmul.msk.f32.gmra.mxu2 %vm336_vm0, %v2356_v30  ;;  %2159 = vmatmul.msk.f32.gmra.mxu3 %vm336_vm0, %v265_v27  ;;  %v1313_v31 = vpop.f32.mrf.mxu0  ;;  %v1474_v1 = vpop.f32.mrf.mxu1 }
 0x1c3   : > { %1763 = vst [vmem:[%s2799_s5 + $0x560] sm:$0xff] %v1313_v31  ;;  %v276_v31 = vld [vmem:[%s2600_s3 + $0x2a0] sm:$0xff] }
 0x1c4   : > { %1764 = vst [vmem:[%s2799_s5 + $0x568] sm:$0xff] %v1474_v1  ;;  %v2367_v1 = vld [vmem:[%s2600_s3 + $0x120] sm:$0xff] }
 0x1c5   : > { %v847_v32 = vpop.f32.mrf.mxu2  ;;  %v1152_v33 = vpop.f32.mrf.mxu3  ;;  %2207 = vmatmul.msk.f32.gmra.mxu0 %vm336_vm0, %v265_v27  ;;  %2255 = vmatmul.msk.f32.gmra.mxu1 %vm336_vm0, %v265_v27 }
 0x1c6   : > { %1620 = vst [vmem:[%s2799_s5 + $0xe8] sm:$0xff] %v847_v32 }
 0x1c7   : > { %1762 = vst [vmem:[%s2799_s5 + $0x558] sm:$0xff] %v1152_v33 }
 0x1ca   : > { %2112 = vmatmul.msk.f32.gmra.mxu2 %vm336_vm0, %v2357_v36  ;;  %2160 = vmatmul.msk.f32.gmra.mxu3 %vm336_vm0, %v266_v29  ;;  %v1316_v3 = vpop.f32.mrf.mxu0  ;;  %v1477_v38 = vpop.f32.mrf.mxu1 }
 0x1cb   : > { %1766 = vst [vmem:[%s2799_s5 + $0x578] sm:$0xff] %v1316_v3  ;;  %v277_v3 = vld [vmem:[%s2600_s3 + $0x2a8] sm:$0xff] }
 0x1cc   : > { %1767 = vst [vmem:[%s2799_s5 + $0x580] sm:$0xff] %v1477_v38  ;;  %v2368_v38 = vld [vmem:[%s2600_s3 + $0x128] sm:$0xff] }
 0x1cd   : > { %v850_v40 = vpop.f32.mrf.mxu2  ;;  %v1155_v41 = vpop.f32.mrf.mxu3  ;;  %2208 = vmatmul.msk.f32.gmra.mxu0 %vm336_vm0, %v266_v29  ;;  %2256 = vmatmul.msk.f32.gmra.mxu1 %vm336_vm0, %v266_v29 }
 0x1ce   : > { %1623 = vst [vmem:[%s2799_s5 + $0x100] sm:$0xff] %v850_v40 }
 0x1cf   : > { %1765 = vst [vmem:[%s2799_s5 + $0x570] sm:$0xff] %v1155_v41 }
 0x1d2   : > { %2113 = vmatmul.msk.f32.gmra.mxu2 %vm336_vm0, %v2358_v5  ;;  %2161 = vmatmul.msk.f32.gmra.mxu3 %vm336_vm0, %v267_v35  ;;  %v1319_v42 = vpop.f32.mrf.mxu0  ;;  %v1480_v44 = vpop.f32.mrf.mxu1 }
 0x1d3   : > { %1769 = vst [vmem:[%s2799_s5 + $0x590] sm:$0xff] %v1319_v42  ;;  %v278_v42 = vld [vmem:[%s2600_s3 + $0x2b0] sm:$0xff] }
 0x1d4   : > { %1770 = vst [vmem:[%s2799_s5 + $0x598] sm:$0xff] %v1480_v44  ;;  %v2369_v44 = vld [vmem:[%s2600_s3 + $0x130] sm:$0xff] }
 0x1d5   : > { %v853_v46 = vpop.f32.mrf.mxu2  ;;  %v1158_v48 = vpop.f32.mrf.mxu3  ;;  %2209 = vmatmul.msk.f32.gmra.mxu0 %vm336_vm0, %v267_v35  ;;  %2257 = vmatmul.msk.f32.gmra.mxu1 %vm336_vm0, %v267_v35 }
 0x1d6   : > { %1626 = vst [vmem:[%s2799_s5 + $0x118] sm:$0xff] %v853_v46 }
 0x1d7   : > { %1768 = vst [vmem:[%s2799_s5 + $0x588] sm:$0xff] %v1158_v48 }
 0x1da   : > { %2114 = vmatmul.msk.f32.gmra.mxu2 %vm336_vm0, %v2359_v37  ;;  %2162 = vmatmul.msk.f32.gmra.mxu3 %vm336_vm0, %v268_v11  ;;  %v1322_v50 = vpop.f32.mrf.mxu0  ;;  %v1483_v51 = vpop.f32.mrf.mxu1 }
 0x1db   : > { %1772 = vst [vmem:[%s2799_s5 + $0x5a8] sm:$0xff] %v1322_v50  ;;  %v279_v50 = vld [vmem:[%s2600_s3 + $0x2b8] sm:$0xff] }
 0x1dc   : > { %1773 = vst [vmem:[%s2799_s5 + $0x5b0] sm:$0xff] %v1483_v51  ;;  %v2370_v51 = vld [vmem:[%s2600_s3 + $0x138] sm:$0xff] }
 0x1dd   : > { %v856_v53 = vpop.f32.mrf.mxu2  ;;  %v1161_v15 = vpop.f32.mrf.mxu3  ;;  %2210 = vmatmul.msk.f32.gmra.mxu0 %vm336_vm0, %v268_v11  ;;  %2258 = vmatmul.msk.f32.gmra.mxu1 %vm336_vm0, %v268_v11 }
 0x1de   : > { %1629 = vst [vmem:[%s2799_s5 + $0x130] sm:$0xff] %v856_v53 }
 0x1df   : > { %1771 = vst [vmem:[%s2799_s5 + $0x5a0] sm:$0xff] %v1161_v15 }
 0x1e2   : > { %2115 = vmatmul.msk.f32.gmra.mxu2 %vm336_vm0, %v2360_v39  ;;  %2163 = vmatmul.msk.f32.gmra.mxu3 %vm336_vm0, %v269_v54  ;;  %v1325_v56 = vpop.f32.mrf.mxu0  ;;  %v1486_v58 = vpop.f32.mrf.mxu1 }
 0x1e3   : > { %1775 = vst [vmem:[%s2799_s5 + $0x5c0] sm:$0xff] %v1325_v56  ;;  %v280_v56 = vld [vmem:[%s2600_s3 + $0x2c0] sm:$0xff] }
 0x1e4   : > { %1776 = vst [vmem:[%s2799_s5 + $0x5c8] sm:$0xff] %v1486_v58  ;;  %v2371_v58 = vld [vmem:[%s2600_s3 + $0x140] sm:$0xff] }
 0x1e5   : > { %v859_v22 = vpop.f32.mrf.mxu2  ;;  %v1164_v60 = vpop.f32.mrf.mxu3  ;;  %2211 = vmatmul.msk.f32.gmra.mxu0 %vm336_vm0, %v269_v54  ;;  %2259 = vmatmul.msk.f32.gmra.mxu1 %vm336_vm0, %v269_v54 }
 0x1e6   : > { %1632 = vst [vmem:[%s2799_s5 + $0x148] sm:$0xff] %v859_v22 }
 0x1e7   : > { %1774 = vst [vmem:[%s2799_s5 + $0x5b8] sm:$0xff] %v1164_v60 }
 0x1ea   : > { %2116 = vmatmul.msk.f32.gmra.mxu2 %vm336_vm0, %v2361_v45  ;;  %2164 = vmatmul.msk.f32.gmra.mxu3 %vm336_vm0, %v270_v62  ;;  %v1328_v63 = vpop.f32.mrf.mxu0  ;;  %v1489_v34 = vpop.f32.mrf.mxu1 }
 0x1eb   : > { %1778 = vst [vmem:[%s2799_s5 + $0x5d8] sm:$0xff] %v1328_v63  ;;  %v281_v63 = vld [vmem:[%s2600_s3 + $0x2c8] sm:$0xff] }
 0x1ec   : > { %1779 = vst [vmem:[%s2799_s5 + $0x5e0] sm:$0xff] %v1489_v34  ;;  %v2372_v34 = vld [vmem:[%s2600_s3 + $0x148] sm:$0xff] }
 0x1ed   : > { %v862_v0 = vpop.f32.mrf.mxu2  ;;  %v1167_v2 = vpop.f32.mrf.mxu3  ;;  %2212 = vmatmul.msk.f32.gmra.mxu0 %vm336_vm0, %v270_v62  ;;  %2260 = vmatmul.msk.f32.gmra.mxu1 %vm336_vm0, %v270_v62 }
 0x1ee   : > { %1635 = vst [vmem:[%s2799_s5 + $0x160] sm:$0xff] %v862_v0 }
 0x1ef   : > { %1777 = vst [vmem:[%s2799_s5 + $0x5d0] sm:$0xff] %v1167_v2 }
 0x1f2   : > { %2117 = vmatmul.msk.f32.gmra.mxu2 %vm336_vm0, %v2362_v47  ;;  %2165 = vmatmul.msk.f32.gmra.mxu3 %vm336_vm0, %v271_v4  ;;  %v1331_v43 = vpop.f32.mrf.mxu0  ;;  %v1492_v7 = vpop.f32.mrf.mxu1 }
 0x1f3   : > { %1781 = vst [vmem:[%s2799_s5 + $0x5f0] sm:$0xff] %v1331_v43  ;;  %v282_v43 = vld [vmem:[%s2600_s3 + $0x2d0] sm:$0xff] }
 0x1f4   : > { %1782 = vst [vmem:[%s2799_s5 + $0x5f8] sm:$0xff] %v1492_v7  ;;  %v2373_v7 = vld [vmem:[%s2600_s3 + $0x150] sm:$0xff] }
 0x1f5   : > { %v865_v8 = vpop.f32.mrf.mxu2  ;;  %v1170_v9 = vpop.f32.mrf.mxu3  ;;  %2213 = vmatmul.msk.f32.gmra.mxu0 %vm336_vm0, %v271_v4  ;;  %2261 = vmatmul.msk.f32.gmra.mxu1 %vm336_vm0, %v271_v4 }
 0x1f6   : > { %1638 = vst [vmem:[%s2799_s5 + $0x178] sm:$0xff] %v865_v8 }
 0x1f7   : > { %1780 = vst [vmem:[%s2799_s5 + $0x5e8] sm:$0xff] %v1170_v9 }
 0x1fa   : > { %2118 = vmatmul.msk.f32.gmra.mxu2 %vm336_vm0, %v2363_v52  ;;  %2166 = vmatmul.msk.f32.gmra.mxu3 %vm336_vm0, %v272_v10  ;;  %v1334_v49 = vpop.f32.mrf.mxu0  ;;  %v1495_v12 = vpop.f32.mrf.mxu1 }
 0x1fb   : > { %1784 = vst [vmem:[%s2799_s5 + $0x608] sm:$0xff] %v1334_v49  ;;  %v283_v49 = vld [vmem:[%s2600_s3 + $0x2d8] sm:$0xff] }
 0x1fc   : > { %1785 = vst [vmem:[%s2799_s5 + $0x610] sm:$0xff] %v1495_v12  ;;  %v2374_v12 = vld [vmem:[%s2600_s3 + $0x158] sm:$0xff] }
 0x1fd   : > { %v868_v14 = vpop.f32.mrf.mxu2  ;;  %v1173_v16 = vpop.f32.mrf.mxu3  ;;  %2214 = vmatmul.msk.f32.gmra.mxu0 %vm336_vm0, %v272_v10  ;;  %2262 = vmatmul.msk.f32.gmra.mxu1 %vm336_vm0, %v272_v10 }
 0x1fe   : > { %1641 = vst [vmem:[%s2799_s5 + $0x190] sm:$0xff] %v868_v14 }
 0x1ff   : > { %1783 = vst [vmem:[%s2799_s5 + $0x600] sm:$0xff] %v1173_v16 }
 0x202   : > { %2119 = vmatmul.msk.f32.gmra.mxu2 %vm336_vm0, %v2364_v17  ;;  %2167 = vmatmul.msk.f32.gmra.mxu3 %vm336_vm0, %v273_v61  ;;  %v1337_v55 = vpop.f32.mrf.mxu0  ;;  %v1498_v18 = vpop.f32.mrf.mxu1 }
 0x203   : > { %1787 = vst [vmem:[%s2799_s5 + $0x620] sm:$0xff] %v1337_v55  ;;  %v284_v55 = vld [vmem:[%s2600_s3 + $0x2e0] sm:$0xff] }
 0x204   : > { %1788 = vst [vmem:[%s2799_s5 + $0x628] sm:$0xff] %v1498_v18  ;;  %v2375_v18 = vld [vmem:[%s2600_s3 + $0x160] sm:$0xff] }
 0x205   : > { %v871_v20 = vpop.f32.mrf.mxu2  ;;  %v1176_v6 = vpop.f32.mrf.mxu3  ;;  %2215 = vmatmul.msk.f32.gmra.mxu0 %vm336_vm0, %v273_v61  ;;  %2263 = vmatmul.msk.f32.gmra.mxu1 %vm336_vm0, %v273_v61 }
 0x206   : > { %1644 = vst [vmem:[%s2799_s5 + $0x1a8] sm:$0xff] %v871_v20 }
 0x207   : > { %1786 = vst [vmem:[%s2799_s5 + $0x618] sm:$0xff] %v1176_v6 }
 0x20a   : > { %2120 = vmatmul.msk.f32.gmra.mxu2 %vm336_vm0, %v2365_v23  ;;  %2168 = vmatmul.msk.f32.gmra.mxu3 %vm336_vm0, %v274_v21  ;;  %v1340_v57 = vpop.f32.mrf.mxu0  ;;  %v1501_v19 = vpop.f32.mrf.mxu1 }
 0x20b   : > { %1790 = vst [vmem:[%s2799_s5 + $0x638] sm:$0xff] %v1340_v57  ;;  %v285_v57 = vld [vmem:[%s2600_s3 + $0x2e8] sm:$0xff] }
 0x20c   : > { %1791 = vst [vmem:[%s2799_s5 + $0x640] sm:$0xff] %v1501_v19  ;;  %v2376_v19 = vld [vmem:[%s2600_s3 + $0x168] sm:$0xff] }
 0x20d   : > { %v874_v13 = vpop.f32.mrf.mxu2  ;;  %v1179_v24 = vpop.f32.mrf.mxu3  ;;  %2216 = vmatmul.msk.f32.gmra.mxu0 %vm336_vm0, %v274_v21  ;;  %2264 = vmatmul.msk.f32.gmra.mxu1 %vm336_vm0, %v274_v21 }
 0x20e   : > { %1647 = vst [vmem:[%s2799_s5 + $0x1c0] sm:$0xff] %v874_v13 }
 0x20f   : > { %1789 = vst [vmem:[%s2799_s5 + $0x630] sm:$0xff] %v1179_v24 }
 0x212   : > { %2121 = vmatmul.msk.f32.gmra.mxu2 %vm336_vm0, %v2366_v26  ;;  %2169 = vmatmul.msk.f32.gmra.mxu3 %vm336_vm0, %v275_v25  ;;  %v1343_v59 = vpop.f32.mrf.mxu0  ;;  %v1504_v28 = vpop.f32.mrf.mxu1 }
 0x213   : > { %1793 = vst [vmem:[%s2799_s5 + $0x650] sm:$0xff] %v1343_v59  ;;  %v286_v59 = vld [vmem:[%s2600_s3 + $0x2f0] sm:$0xff] }
 0x214   : > { %1794 = vst [vmem:[%s2799_s5 + $0x658] sm:$0xff] %v1504_v28  ;;  %v2377_v28 = vld [vmem:[%s2600_s3 + $0x170] sm:$0xff] }
 0x215   : > { %v877_v27 = vpop.f32.mrf.mxu2  ;;  %v1182_v30 = vpop.f32.mrf.mxu3  ;;  %2217 = vmatmul.msk.f32.gmra.mxu0 %vm336_vm0, %v275_v25  ;;  %2265 = vmatmul.msk.f32.gmra.mxu1 %vm336_vm0, %v275_v25 }
 0x216   : > { %1650 = vst [vmem:[%s2799_s5 + $0x1d8] sm:$0xff] %v877_v27 }
 0x217   : > { %1792 = vst [vmem:[%s2799_s5 + $0x648] sm:$0xff] %v1182_v30 }
 0x21a   : > { %2122 = vmatmul.msk.f32.gmra.mxu2 %vm336_vm0, %v2367_v1  ;;  %2170 = vmatmul.msk.f32.gmra.mxu3 %vm336_vm0, %v276_v31  ;;  %v1346_v32 = vpop.f32.mrf.mxu0  ;;  %v1507_v33 = vpop.f32.mrf.mxu1 }
 0x21b   : > { %1796 = vst [vmem:[%s2799_s5 + $0x668] sm:$0xff] %v1346_v32  ;;  %v287_v32 = vld [vmem:[%s2600_s3 + $0x2f8] sm:$0xff] }
 0x21c   : > { %1797 = vst [vmem:[%s2799_s5 + $0x670] sm:$0xff] %v1507_v33  ;;  %v2378_v33 = vld [vmem:[%s2600_s3 + $0x178] sm:$0xff] }
 0x21d   : > { %v880_v29 = vpop.f32.mrf.mxu2  ;;  %v1185_v36 = vpop.f32.mrf.mxu3  ;;  %2218 = vmatmul.msk.f32.gmra.mxu0 %vm336_vm0, %v276_v31  ;;  %2266 = vmatmul.msk.f32.gmra.mxu1 %vm336_vm0, %v276_v31 }
 0x21e   : > { %1653 = vst [vmem:[%s2799_s5 + $0x1f0] sm:$0xff] %v880_v29 }
 0x21f   : > { %1795 = vst [vmem:[%s2799_s5 + $0x660] sm:$0xff] %v1185_v36 }
 0x222   : > { %2123 = vmatmul.msk.f32.gmra.mxu2 %vm336_vm0, %v2368_v38  ;;  %2171 = vmatmul.msk.f32.gmra.mxu3 %vm336_vm0, %v277_v3  ;;  %v1349_v40 = vpop.f32.mrf.mxu0  ;;  %v1510_v41 = vpop.f32.mrf.mxu1 }
 0x223   : > { %1799 = vst [vmem:[%s2799_s5 + $0x680] sm:$0xff] %v1349_v40 }
 0x224   : > { %1800 = vst [vmem:[%s2799_s5 + $0x688] sm:$0xff] %v1510_v41 }
 0x225   : > { %v883_v35 = vpop.f32.mrf.mxu2  ;;  %v1188_v5 = vpop.f32.mrf.mxu3  ;;  %2219 = vmatmul.msk.f32.gmra.mxu0 %vm336_vm0, %v277_v3  ;;  %2267 = vmatmul.msk.f32.gmra.mxu1 %vm336_vm0, %v277_v3 }
 0x226   : > { %1656 = vst [vmem:[%s2799_s5 + $0x208] sm:$0xff] %v883_v35 }
 0x227   : > { %1798 = vst [vmem:[%s2799_s5 + $0x678] sm:$0xff] %v1188_v5 }
 0x22a   : > { %2124 = vmatmul.msk.f32.gmra.mxu2 %vm336_vm0, %v2369_v44  ;;  %2172 = vmatmul.msk.f32.gmra.mxu3 %vm336_vm0, %v278_v42  ;;  %v1352_v46 = vpop.f32.mrf.mxu0  ;;  %v1513_v48 = vpop.f32.mrf.mxu1 }
 0x22b   : > { %1802 = vst [vmem:[%s2799_s5 + $0x698] sm:$0xff] %v1352_v46 }
 0x22c   : > { %1803 = vst [vmem:[%s2799_s5 + $0x6a0] sm:$0xff] %v1513_v48 }
 0x22d   : > { %v886_v11 = vpop.f32.mrf.mxu2  ;;  %v1191_v37 = vpop.f32.mrf.mxu3  ;;  %2220 = vmatmul.msk.f32.gmra.mxu0 %vm336_vm0, %v278_v42  ;;  %2268 = vmatmul.msk.f32.gmra.mxu1 %vm336_vm0, %v278_v42 }
 0x22e   : > { %1659 = vst [vmem:[%s2799_s5 + $0x220] sm:$0xff] %v886_v11 }
 0x22f   : > { %1801 = vst [vmem:[%s2799_s5 + $0x690] sm:$0xff] %v1191_v37 }
 0x232   : > { %2125 = vmatmul.msk.f32.gmra.mxu2 %vm336_vm0, %v2370_v51  ;;  %2173 = vmatmul.msk.f32.gmra.mxu3 %vm336_vm0, %v279_v50  ;;  %v1355_v53 = vpop.f32.mrf.mxu0  ;;  %v1516_v15 = vpop.f32.mrf.mxu1 }
 0x233   : > { %1805 = vst [vmem:[%s2799_s5 + $0x6b0] sm:$0xff] %v1355_v53 }
 0x234   : > { %1806 = vst [vmem:[%s2799_s5 + $0x6b8] sm:$0xff] %v1516_v15 }
 0x235   : > { %v889_v54 = vpop.f32.mrf.mxu2  ;;  %v1194_v39 = vpop.f32.mrf.mxu3  ;;  %2221 = vmatmul.msk.f32.gmra.mxu0 %vm336_vm0, %v279_v50  ;;  %2269 = vmatmul.msk.f32.gmra.mxu1 %vm336_vm0, %v279_v50 }
 0x236   : > { %1662 = vst [vmem:[%s2799_s5 + $0x238] sm:$0xff] %v889_v54 }
 0x237   : > { %1804 = vst [vmem:[%s2799_s5 + $0x6a8] sm:$0xff] %v1194_v39 }
 0x23a   : > { %2126 = vmatmul.msk.f32.gmra.mxu2 %vm336_vm0, %v2371_v58  ;;  %2174 = vmatmul.msk.f32.gmra.mxu3 %vm336_vm0, %v280_v56  ;;  %v1358_v22 = vpop.f32.mrf.mxu0  ;;  %v1519_v60 = vpop.f32.mrf.mxu1 }
 0x23b   : > { %1808 = vst [vmem:[%s2799_s5 + $0x6c8] sm:$0xff] %v1358_v22 }
 0x23c   : > { %1809 = vst [vmem:[%s2799_s5 + $0x6d0] sm:$0xff] %v1519_v60 }
 0x23d   : > { %v892_v62 = vpop.f32.mrf.mxu2  ;;  %v1197_v45 = vpop.f32.mrf.mxu3  ;;  %2222 = vmatmul.msk.f32.gmra.mxu0 %vm336_vm0, %v280_v56  ;;  %2270 = vmatmul.msk.f32.gmra.mxu1 %vm336_vm0, %v280_v56 }
 0x23e   : > { %1665 = vst [vmem:[%s2799_s5 + $0x250] sm:$0xff] %v892_v62 }
 0x23f   : > { %1807 = vst [vmem:[%s2799_s5 + $0x6c0] sm:$0xff] %v1197_v45 }
 0x242   : > { %2127 = vmatmul.msk.f32.gmra.mxu2 %vm336_vm0, %v2372_v34  ;;  %2175 = vmatmul.msk.f32.gmra.mxu3 %vm336_vm0, %v281_v63  ;;  %v1361_v0 = vpop.f32.mrf.mxu0  ;;  %v1522_v2 = vpop.f32.mrf.mxu1 }
 0x243   : > { %1811 = vst [vmem:[%s2799_s5 + $0x6e0] sm:$0xff] %v1361_v0 }
 0x244   : > { %1812 = vst [vmem:[%s2799_s5 + $0x6e8] sm:$0xff] %v1522_v2 }
 0x245   : > { %v895_v4 = vpop.f32.mrf.mxu2  ;;  %v1200_v47 = vpop.f32.mrf.mxu3  ;;  %2223 = vmatmul.msk.f32.gmra.mxu0 %vm336_vm0, %v281_v63  ;;  %2271 = vmatmul.msk.f32.gmra.mxu1 %vm336_vm0, %v281_v63 }
 0x246   : > { %1668 = vst [vmem:[%s2799_s5 + $0x268] sm:$0xff] %v895_v4 }
 0x247   : > { %1810 = vst [vmem:[%s2799_s5 + $0x6d8] sm:$0xff] %v1200_v47 }
 0x24a   : > { %2128 = vmatmul.msk.f32.gmra.mxu2 %vm336_vm0, %v2373_v7  ;;  %2176 = vmatmul.msk.f32.gmra.mxu3 %vm336_vm0, %v282_v43  ;;  %v1364_v8 = vpop.f32.mrf.mxu0  ;;  %v1525_v9 = vpop.f32.mrf.mxu1 }
 0x24b   : > { %1814 = vst [vmem:[%s2799_s5 + $0x6f8] sm:$0xff] %v1364_v8 }
 0x24c   : > { %1815 = vst [vmem:[%s2799_s5 + $0x700] sm:$0xff] %v1525_v9 }
 0x24d   : > { %v898_v10 = vpop.f32.mrf.mxu2  ;;  %v1203_v52 = vpop.f32.mrf.mxu3  ;;  %2224 = vmatmul.msk.f32.gmra.mxu0 %vm336_vm0, %v282_v43  ;;  %2272 = vmatmul.msk.f32.gmra.mxu1 %vm336_vm0, %v282_v43 }
 0x24e   : > { %1671 = vst [vmem:[%s2799_s5 + $0x280] sm:$0xff] %v898_v10 }
 0x24f   : > { %1813 = vst [vmem:[%s2799_s5 + $0x6f0] sm:$0xff] %v1203_v52 }
 0x252   : > { %2129 = vmatmul.msk.f32.gmra.mxu2 %vm336_vm0, %v2374_v12  ;;  %2177 = vmatmul.msk.f32.gmra.mxu3 %vm336_vm0, %v283_v49  ;;  %v1367_v14 = vpop.f32.mrf.mxu0  ;;  %v1528_v16 = vpop.f32.mrf.mxu1 }
 0x253   : > { %1817 = vst [vmem:[%s2799_s5 + $0x710] sm:$0xff] %v1367_v14 }
 0x254   : > { %1818 = vst [vmem:[%s2799_s5 + $0x718] sm:$0xff] %v1528_v16 }
 0x255   : > { %v901_v61 = vpop.f32.mrf.mxu2  ;;  %v1206_v17 = vpop.f32.mrf.mxu3  ;;  %2225 = vmatmul.msk.f32.gmra.mxu0 %vm336_vm0, %v283_v49  ;;  %2273 = vmatmul.msk.f32.gmra.mxu1 %vm336_vm0, %v283_v49 }
 0x256   : > { %1674 = vst [vmem:[%s2799_s5 + $0x298] sm:$0xff] %v901_v61 }
 0x257   : > { %1816 = vst [vmem:[%s2799_s5 + $0x708] sm:$0xff] %v1206_v17 }
 0x25a   : > { %2130 = vmatmul.msk.f32.gmra.mxu2 %vm336_vm0, %v2375_v18  ;;  %2178 = vmatmul.msk.f32.gmra.mxu3 %vm336_vm0, %v284_v55  ;;  %v1370_v20 = vpop.f32.mrf.mxu0  ;;  %v1531_v6 = vpop.f32.mrf.mxu1 }
 0x25b   : > { %1820 = vst [vmem:[%s2799_s5 + $0x728] sm:$0xff] %v1370_v20 }
 0x25c   : > { %1821 = vst [vmem:[%s2799_s5 + $0x730] sm:$0xff] %v1531_v6 }
 0x25d   : > { %v904_v21 = vpop.f32.mrf.mxu2  ;;  %v1209_v23 = vpop.f32.mrf.mxu3  ;;  %2226 = vmatmul.msk.f32.gmra.mxu0 %vm336_vm0, %v284_v55  ;;  %2274 = vmatmul.msk.f32.gmra.mxu1 %vm336_vm0, %v284_v55 }
 0x25e   : > { %1677 = vst [vmem:[%s2799_s5 + $0x2b0] sm:$0xff] %v904_v21 }
 0x25f   : > { %1819 = vst [vmem:[%s2799_s5 + $0x720] sm:$0xff] %v1209_v23 }
 0x262   : > { %2131 = vmatmul.msk.f32.gmra.mxu2 %vm336_vm0, %v2376_v19  ;;  %2179 = vmatmul.msk.f32.gmra.mxu3 %vm336_vm0, %v285_v57  ;;  %v1373_v13 = vpop.f32.mrf.mxu0  ;;  %v1534_v24 = vpop.f32.mrf.mxu1 }
 0x263   : > { %1823 = vst [vmem:[%s2799_s5 + $0x740] sm:$0xff] %v1373_v13 }
 0x264   : > { %1824 = vst [vmem:[%s2799_s5 + $0x748] sm:$0xff] %v1534_v24 }
 0x265   : > { %v907_v25 = vpop.f32.mrf.mxu2  ;;  %v1212_v26 = vpop.f32.mrf.mxu3  ;;  %2227 = vmatmul.msk.f32.gmra.mxu0 %vm336_vm0, %v285_v57  ;;  %2275 = vmatmul.msk.f32.gmra.mxu1 %vm336_vm0, %v285_v57 }
 0x266   : > { %1680 = vst [vmem:[%s2799_s5 + $0x2c8] sm:$0xff] %v907_v25 }
 0x267   : > { %1822 = vst [vmem:[%s2799_s5 + $0x738] sm:$0xff] %v1212_v26 }
 0x26a   : > { %2132 = vmatmul.msk.f32.gmra.mxu2 %vm336_vm0, %v2377_v28  ;;  %2180 = vmatmul.msk.f32.gmra.mxu3 %vm336_vm0, %v286_v59  ;;  %v1376_v27 = vpop.f32.mrf.mxu0  ;;  %v1537_v30 = vpop.f32.mrf.mxu1 }
 0x26b   : > { %1826 = vst [vmem:[%s2799_s5 + $0x758] sm:$0xff] %v1376_v27 }
 0x26c   : > { %1827 = vst [vmem:[%s2799_s5 + $0x760] sm:$0xff] %v1537_v30 }
 0x26d   : > { %v910_v31 = vpop.f32.mrf.mxu2  ;;  %v1215_v1 = vpop.f32.mrf.mxu3  ;;  %2228 = vmatmul.msk.f32.gmra.mxu0 %vm336_vm0, %v286_v59  ;;  %2276 = vmatmul.msk.f32.gmra.mxu1 %vm336_vm0, %v286_v59 }
 0x26e   : > { %1683 = vst [vmem:[%s2799_s5 + $0x2e0] sm:$0xff] %v910_v31 }
 0x26f   : > { %1825 = vst [vmem:[%s2799_s5 + $0x750] sm:$0xff] %v1215_v1 }
 0x272   : > { %2133 = vmatmul.msk.f32.gmra.mxu2 %vm336_vm0, %v2378_v33  ;;  %2181 = vmatmul.msk.f32.gmra.mxu3 %vm336_vm0, %v287_v32  ;;  %v1379_v29 = vpop.f32.mrf.mxu0  ;;  %v1540_v36 = vpop.f32.mrf.mxu1 }
 0x273   : > { %1829 = vst [vmem:[%s2799_s5 + $0x770] sm:$0xff] %v1379_v29 }
 0x274   : > { %1830 = vst [vmem:[%s2799_s5 + $0x778] sm:$0xff] %v1540_v36 }
 0x275   : > { %v913_v3 = vpop.f32.mrf.mxu2  ;;  %v1218_v38 = vpop.f32.mrf.mxu3  ;;  %2229 = vmatmul.msk.f32.gmra.mxu0 %vm336_vm0, %v287_v32  ;;  %2277 = vmatmul.msk.f32.gmra.mxu1 %vm336_vm0, %v287_v32 }
 0x276   : > { %1686 = vst [vmem:[%s2799_s5 + $0x2f8] sm:$0xff] %v913_v3 }
 0x277   : > { %1828 = vst [vmem:[%s2799_s5 + $0x768] sm:$0xff] %v1218_v38 }
 0x27a   : > { %v1382_v40 = vpop.f32.mrf.mxu0  ;;  %v1543_v41 = vpop.f32.mrf.mxu1 }
 0x27b   : > { %1832 = vst [vmem:[%s2799_s5 + $0x788] sm:$0xff] %v1382_v40 }
 0x27c   : > { %1833 = vst [vmem:[%s2799_s5 + $0x790] sm:$0xff] %v1543_v41 }
 0x27d   : > { %v916_v35 = vpop.f32.mrf.mxu2  ;;  %v1221_v5 = vpop.f32.mrf.mxu3 }
 0x27e   : > { %1689 = vst [vmem:[%s2799_s5 + $0x310] sm:$0xff] %v916_v35 }
 0x27f   : > { %1831 = vst [vmem:[%s2799_s5 + $0x780] sm:$0xff] %v1221_v5 }
 0x282   : > { %v1385_v42 = vpop.f32.mrf.mxu0  ;;  %v1546_v44 = vpop.f32.mrf.mxu1 }
 0x283   : > { %1835 = vst [vmem:[%s2799_s5 + $0x7a0] sm:$0xff] %v1385_v42 }
 0x284   : > { %1836 = vst [vmem:[%s2799_s5 + $0x7a8] sm:$0xff] %v1546_v44 }
 0x285   : > { %v919_v46 = vpop.f32.mrf.mxu2  ;;  %v1224_v48 = vpop.f32.mrf.mxu3 }
 0x286   : > { %1692 = vst [vmem:[%s2799_s5 + $0x328] sm:$0xff] %v919_v46 }
 0x287   : > { %1834 = vst [vmem:[%s2799_s5 + $0x798] sm:$0xff] %v1224_v48 }
 0x28a   : > { %v1388_v11 = vpop.f32.mrf.mxu0  ;;  %v1549_v37 = vpop.f32.mrf.mxu1 }
 0x28b   : > { %1838 = vst [vmem:[%s2799_s5 + $0x7b8] sm:$0xff] %v1388_v11 }
 0x28c   : > { %1839 = vst [vmem:[%s2799_s5 + $0x7c0] sm:$0xff] %v1549_v37 }
 0x28d   : > { %v922_v50 = vpop.f32.mrf.mxu2  ;;  %v1227_v51 = vpop.f32.mrf.mxu3 }
 0x28e   : > { %1695 = vst [vmem:[%s2799_s5 + $0x340] sm:$0xff] %v922_v50 }
 0x28f   : > { %1837 = vst [vmem:[%s2799_s5 + $0x7b0] sm:$0xff] %v1227_v51 }
 0x292   : > { %v1391_v53 = vpop.f32.mrf.mxu0  ;;  %v1552_v15 = vpop.f32.mrf.mxu1 }
 0x293   : > { %1841 = vst [vmem:[%s2799_s5 + $0x7d0] sm:$0xff] %v1391_v53 }
 0x294   : > { %1842 = vst [vmem:[%s2799_s5 + $0x7d8] sm:$0xff] %v1552_v15 }
 0x295   : > { %v925_v54 = vpop.f32.mrf.mxu2  ;;  %v1230_v39 = vpop.f32.mrf.mxu3 }
 0x296   : > { %1698 = vst [vmem:[%s2799_s5 + $0x358] sm:$0xff] %v925_v54 }
 0x297   : > { %1840 = vst [vmem:[%s2799_s5 + $0x7c8] sm:$0xff] %v1230_v39 }
 0x29a   : > { %v1394_v56 = vpop.f32.mrf.mxu0  ;;  %v1555_v58 = vpop.f32.mrf.mxu1 }
 0x29b   : > { %1844 = vst [vmem:[%s2799_s5 + $0x7e8] sm:$0xff] %v1394_v56 }
 0x29c   : > { %1845 = vst [vmem:[%s2799_s5 + $0x7f0] sm:$0xff] %v1555_v58 }
 0x29d   : > { %v928_v22 = vpop.f32.mrf.mxu2  ;;  %v1233_v60 = vpop.f32.mrf.mxu3 }
 0x29e   : > { %1701 = vst [vmem:[%s2799_s5 + $0x370] sm:$0xff] %v928_v22 }
 0x29f   : > { %1843 = vst [vmem:[%s2799_s5 + $0x7e0] sm:$0xff] %v1233_v60 }
 0x2a2   : > { %v1397_v62 = vpop.f32.mrf.mxu0  ;;  %v1558_v45 = vpop.f32.mrf.mxu1 }
 0x2a3   : > { %1847 = vst [vmem:[%s2799_s5 + $0x800] sm:$0xff] %v1397_v62 }
 0x2a4   : > { %1848 = vst [vmem:[%s2799_s5 + $0x808] sm:$0xff] %v1558_v45 }
 0x2a5   : > { %v931_v63 = vpop.f32.mrf.mxu2  ;;  %v1236_v34 = vpop.f32.mrf.mxu3 }
 0x2a6   : > { %1704 = vst [vmem:[%s2799_s5 + $0x388] sm:$0xff] %v931_v63 }
 0x2a7   : > { %1846 = vst [vmem:[%s2799_s5 + $0x7f8] sm:$0xff] %v1236_v34 }
 0x2aa   : > { %v1400_v0 = vpop.f32.mrf.mxu0  ;;  %v1561_v2 = vpop.f32.mrf.mxu1 }
 0x2ab   : > { %1850 = vst [vmem:[%s2799_s5 + $0x818] sm:$0xff] %v1400_v0 }
 0x2ac   : > { %1851 = vst [vmem:[%s2799_s5 + $0x820] sm:$0xff] %v1561_v2 }
 0x2ad   : > { %v934_v4 = vpop.f32.mrf.mxu2  ;;  %v1239_v47 = vpop.f32.mrf.mxu3 }
 0x2ae   : > { %1707 = vst [vmem:[%s2799_s5 + $0x3a0] sm:$0xff] %v934_v4 }
 0x2af   : > { %1849 = vst [vmem:[%s2799_s5 + $0x810] sm:$0xff] %v1239_v47 }
 0x2b2   : > { %v1403_v43 = vpop.f32.mrf.mxu0  ;;  %v1564_v7 = vpop.f32.mrf.mxu1 }
 0x2b3   : > { %1853 = vst [vmem:[%s2799_s5 + $0x830] sm:$0xff] %v1403_v43 }
 0x2b4   : > { %1854 = vst [vmem:[%s2799_s5 + $0x838] sm:$0xff] %v1564_v7 }
 0x2b5   : > { %v937_v8 = vpop.f32.mrf.mxu2  ;;  %v1242_v9 = vpop.f32.mrf.mxu3 }
 0x2b6   : > { %1710 = vst [vmem:[%s2799_s5 + $0x3b8] sm:$0xff] %v937_v8 }
 0x2b7   : > { %1852 = vst [vmem:[%s2799_s5 + $0x828] sm:$0xff] %v1242_v9 }
 0x2ba   : > { %v1406_v10 = vpop.f32.mrf.mxu0  ;;  %v1567_v52 = vpop.f32.mrf.mxu1 }
 0x2bb   : > { %1856 = vst [vmem:[%s2799_s5 + $0x848] sm:$0xff] %v1406_v10 }
 0x2bc   : > { %1857 = vst [vmem:[%s2799_s5 + $0x850] sm:$0xff] %v1567_v52 }
 0x2bd   : > { %v940_v49 = vpop.f32.mrf.mxu2  ;;  %v1245_v12 = vpop.f32.mrf.mxu3 }
 0x2be   : > { %1713 = vst [vmem:[%s2799_s5 + $0x3d0] sm:$0xff] %v940_v49 }
 0x2bf   : > { %1855 = vst [vmem:[%s2799_s5 + $0x840] sm:$0xff] %v1245_v12 }
 0x2c2   : > { %v1409_v14 = vpop.f32.mrf.mxu0  ;;  %v1570_v16 = vpop.f32.mrf.mxu1 }
 0x2c3   : > { %1859 = vst [vmem:[%s2799_s5 + $0x860] sm:$0xff] %v1409_v14 }
 0x2c4   : > { %1860 = vst [vmem:[%s2799_s5 + $0x868] sm:$0xff] %v1570_v16 }
 0x2c5   : > { %v943_v61 = vpop.f32.mrf.mxu2  ;;  %v1248_v17 = vpop.f32.mrf.mxu3 }
 0x2c6   : > { %1716 = vst [vmem:[%s2799_s5 + $0x3e8] sm:$0xff] %v943_v61 }
 0x2c7   : > { %1858 = vst [vmem:[%s2799_s5 + $0x858] sm:$0xff] %v1248_v17 }
 0x2ca   : > { %v1412_v55 = vpop.f32.mrf.mxu0  ;;  %v1573_v18 = vpop.f32.mrf.mxu1 }
 0x2cb   : > { %1862 = vst [vmem:[%s2799_s5 + $0x878] sm:$0xff] %v1412_v55 }
 0x2cc   : > { %1863 = vst [vmem:[%s2799_s5 + $0x880] sm:$0xff] %v1573_v18 }
 0x2cd   : > { %v946_v20 = vpop.f32.mrf.mxu2  ;;  %v1251_v6 = vpop.f32.mrf.mxu3 }
 0x2ce   : > { %1719 = vst [vmem:[%s2799_s5 + $0x400] sm:$0xff] %v946_v20 }
 0x2cf   : > { %1861 = vst [vmem:[%s2799_s5 + $0x870] sm:$0xff] %v1251_v6 }
 0x2d2   : > { %v1415_v21 = vpop.f32.mrf.mxu0  ;;  %v1576_v23 = vpop.f32.mrf.mxu1 }
 0x2d3   : > { %1865 = vst [vmem:[%s2799_s5 + $0x890] sm:$0xff] %v1415_v21 }
 0x2d4   : > { %1866 = vst [vmem:[%s2799_s5 + $0x898] sm:$0xff] %v1576_v23 }
 0x2d5   : > { %v949_v57 = vpop.f32.mrf.mxu2  ;;  %v1254_v19 = vpop.f32.mrf.mxu3 }
 0x2d6   : > { %1722 = vst [vmem:[%s2799_s5 + $0x418] sm:$0xff] %v949_v57 }
 0x2d7   : > { %1864 = vst [vmem:[%s2799_s5 + $0x888] sm:$0xff] %v1254_v19 }
 0x2da   : > { %v1418_v13 = vpop.f32.mrf.mxu0  ;;  %v1579_v24 = vpop.f32.mrf.mxu1 }
 0x2db   : > { %1868 = vst [vmem:[%s2799_s5 + $0x8a8] sm:$0xff] %v1418_v13 }
 0x2dc   : > { %1869 = vst [vmem:[%s2799_s5 + $0x8b0] sm:$0xff] %v1579_v24 }
 0x2dd   : > { %v952_v25 = vpop.f32.mrf.mxu2  ;;  %v1257_v26 = vpop.f32.mrf.mxu3 }
 0x2de   : > { %1725 = vst [vmem:[%s2799_s5 + $0x430] sm:$0xff] %v952_v25 }
 0x2df   : > { %1867 = vst [vmem:[%s2799_s5 + $0x8a0] sm:$0xff] %v1257_v26 }
 0x2e2   : > { %v1421_v59 = vpop.f32.mrf.mxu0  ;;  %v1582_v28 = vpop.f32.mrf.mxu1 }
 0x2e3   : > { %1871 = vst [vmem:[%s2799_s5 + $0x8c0] sm:$0xff] %v1421_v59 }
 0x2e4   : > { %1872 = vst [vmem:[%s2799_s5 + $0x8c8] sm:$0xff] %v1582_v28 }
 0x2e5   : > { %v955_v27 = vpop.f32.mrf.mxu2  ;;  %v1260_v30 = vpop.f32.mrf.mxu3 }
 0x2e6   : > { %1728 = vst [vmem:[%s2799_s5 + $0x448] sm:$0xff] %v955_v27 }
 0x2e7   : > { %1870 = vst [vmem:[%s2799_s5 + $0x8b8] sm:$0xff] %v1260_v30 }
 0x2ea   : > { %v1424_v31 = vpop.f32.mrf.mxu0  ;;  %v1585_v1 = vpop.f32.mrf.mxu1 }
 0x2eb   : > { %1874 = vst [vmem:[%s2799_s5 + $0x8d8] sm:$0xff] %v1424_v31 }
 0x2ec   : > { %1875 = vst [vmem:[%s2799_s5 + $0x8e0] sm:$0xff] %v1585_v1 }
 0x2ed   : > { %v958_v32 = vpop.f32.mrf.mxu2  ;;  %v1263_v33 = vpop.f32.mrf.mxu3 }
 0x2ee   : > { %1731 = vst [vmem:[%s2799_s5 + $0x460] sm:$0xff] %v958_v32 }
 0x2ef   : > { %1873 = vst [vmem:[%s2799_s5 + $0x8d0] sm:$0xff] %v1263_v33 }
 0x2f2   : > { %v1427_v29 = vpop.f32.mrf.mxu0  ;;  %v1588_v36 = vpop.f32.mrf.mxu1 }
 0x2f3   : > { %1877 = vst [vmem:[%s2799_s5 + $0x8f0] sm:$0xff] %v1427_v29 }
 0x2f4   : > { %1878 = vst [vmem:[%s2799_s5 + $0x8f8] sm:$0xff] %v1588_v36 }
 0x2f5   : > { %v961_v3 = vpop.f32.mrf.mxu2  ;;  %v1266_v38 = vpop.f32.mrf.mxu3 }
 0x2f6   : > { %1734 = vst [vmem:[%s2799_s5 + $0x478] sm:$0xff] %v961_v3 }
 0x2f7   : > { %1876 = vst [vmem:[%s2799_s5 + $0x8e8] sm:$0xff] %v1266_v38 }
 0x2f8   : > { %2436 = shalt.err (!%p2433_p8)
}
 0x2f9   : > { %s2479_s24 = smov 384   ;;  %s2480_s29 = smov 24  }
 0x2fa   : > { %2307 = dma.vmem_to_hbm [thread:$0]  (%p2542_p11), %s1894_s16, 36864, %s1896_s17, %s1880_s13, %s2479_s24, %s2479_s24, %s2480_s29  }
 0x2fb PF: > { %s1910_s30 = sand.u32 1, %s2463_s9   ;;  %p2314_p10 = pnand %p1983_p9, %p2546_p12 }
 0x2fc   : > { %s1911_s3 = scalar_lea.sflag [#allocation4], %s1910_s30 }
 0x2fd   : > { %p2315_p0 = pneg %p2314_p10 }
 0x2ff   : > { %2458 = dma.done.wait (%p2315_p0), %s1911_s3, 36864  }
 0x300   : > { %2460 = vsyncadd (%p2315_p0), %s1911_s3, 4294930432  ;;  %p15_p1 = scmp.ge.s32.totalorder %s2521_s15, 4   ;;  %s3496_s9 = smov %s2467_s10 }
 0x301   : > { %s3497_s10 = smov %s2471_s11  ;;  %s3498_s11 = smov %s2533_s18 }
 0x302   : > { %s3499_s12 = smov %s2521_s15  ;;  %17 = sbr.rel (!%p15_p1) target bundleno = 5 (0x5), region = 76 }
 0x307   :  { %1917 = vsyncpa [#allocation3], 1 }
 0x308   :  { %1919 = vsyncpa [#allocation3 + $0x1], 1 }
 0x309   :  { %1920 = vsyncpa [#allocation4], 1 }
 0x30a   :  { %1922 = vsyncpa [#allocation4 + $0x1], 1 }

</bundles_post_ra>
